<compile_context>
chip_gen: v6e
topology: v6e:2x2x1
jax: 0.10.0
libtpu: 0.0.40
codegen_flags: <defaults>
</compile_context>

<pallas_src>
import functools

import jax
import jax.numpy as jnp
from jax.experimental import pallas as pl
from jax.experimental.pallas import tpu as pltpu


# ----------------------------- Pallas kernel --------------------------------


def _fused_mapper_kernel(
    seq_ref,                                  # (Bblk, S, D) layer-0 input sequence (f32)
    ln1w_ref, ln1b_ref,                       # (1, 1, D) f32
    wqkv_ref,                                 # (1, D, 3D)  [q|k|v], scale folded into q cols
    wproj_ref, bproj_ref,                     # (1, D, D), (1, 1, D)
    ln2w_ref, ln2b_ref,                       # (1, 1, D) f32
    wfc1_ref, bfc1_ref,                       # (1, D, Hm), (1, 1, Hm)
    wfc2_ref, bfc2_ref,                       # (1, Hm, D), (1, 1, D)
    out_ref,                                  # (Bblk, S, D) f32, resident across the layer axis
    *, num_heads: int, s_real: int, eps: float = 1e-5, compute_dtype=jnp.bfloat16,
):
    layer = pl.program_id(1)

    @pl.when(layer == 0)
    def _():
        out_ref[...] = seq_ref[...]

    Bblk, S, D = out_ref.shape
    hd = D // num_heads
    M = Bblk * S

    # Residual stream with batch folded into the matmul M dimension (free reshape,
    # S is a multiple of 8 by construction in the wrapper).
    x = out_ref[...].reshape(M, D)

    def layernorm(h, w, b):                   # stats in f32
        mu = jnp.mean(h, axis=-1, keepdims=True)
        var = jnp.mean((h - mu) ** 2, axis=-1, keepdims=True)
        return (h - mu) * jax.lax.rsqrt(var + eps) * w + b

    # ---- Pre-LN multi-head self-attention (bias=False on the q/kv projections). ----
    n1 = layernorm(x, ln1w_ref[0], ln1b_ref[0]).astype(compute_dtype)        # (M, D)

    # One fused lane-dense QKV matmul: (M, D) x (D, 3D) -> (M, 3D), f32 accumulation.
    qkv = jnp.dot(n1, wqkv_ref[0].astype(compute_dtype),
                  preferred_element_type=jnp.float32).reshape(Bblk, S, 3 * D)
    q_all = qkv[:, :, :D]
    k_all = qkv[:, :, D:2 * D]
    v_all = qkv[:, :, 2 * D:]

    # Mask for padded key positions (compile-time constant; skipped when no padding).
    if s_real < S:
        key_pos = jax.lax.broadcasted_iota(jnp.int32, (1, 1, S), 2)
        key_bias = jnp.where(key_pos >= s_real, jnp.float32(-1e30), jnp.float32(0.0))
    else:
        key_bias = None

    # Tiny per-head (S x S) attention; the heavy matmuls above/below are already fused.
    head_outs = []
    for h in range(num_heads):                # static unroll; per-head working set is tiny
        qh = q_all[:, :, h * hd:(h + 1) * hd]
        kh = k_all[:, :, h * hd:(h + 1) * hd]
        vh = v_all[:, :, h * hd:(h + 1) * hd]

        s = jnp.einsum("bnd,bmd->bnm",
                       qh.astype(compute_dtype), kh.astype(compute_dtype),
                       preferred_element_type=jnp.float32)                   # (Bblk, S, S)
        if key_bias is not None:
            s = s + key_bias
        s_max = jnp.max(s, axis=-1, keepdims=True)                           # f32 softmax stats
        p = jnp.exp(s - s_max)
        a = p * pl.reciprocal(jnp.sum(p, axis=-1, keepdims=True), approx=True)

        head_outs.append(
            jnp.einsum("bnm,bmd->bnd",
                       a.astype(compute_dtype), vh.astype(compute_dtype),
                       preferred_element_type=jnp.float32))                  # (Bblk, S, hd)

    o = jnp.concatenate(head_outs, axis=-1).reshape(M, D)                    # one-time lane concat
    attn = jnp.dot(o.astype(compute_dtype), wproj_ref[0].astype(compute_dtype),
                   preferred_element_type=jnp.float32) + bproj_ref[0]

    x1 = x + attn

    # ---- Pre-LN MLP (fc1 -> relu -> fc2); dropout==0 is identity. ----
    n2 = layernorm(x1, ln2w_ref[0], ln2b_ref[0]).astype(compute_dtype)
    h1 = jnp.maximum(
        jnp.dot(n2, wfc1_ref[0].astype(compute_dtype),
                preferred_element_type=jnp.float32) + bfc1_ref[0], 0.0)
    h2 = jnp.dot(h1.astype(compute_dtype), wfc2_ref[0].astype(compute_dtype),
                 preferred_element_type=jnp.float32) + bfc2_ref[0]

    out_ref[...] = (x1 + h2).reshape(Bblk, S, D).astype(out_ref.dtype)


# ------------------------------ Python wrappers ------------------------------


_STACK_ORDER = ("ln1_w", "ln1_b", "wqkv", "wproj", "bproj",
                "ln2_w", "ln2_b", "wfc1", "bfc1", "wfc2", "bfc2")


def prepare_stacked_params(params, num_heads, weight_dtype=jnp.bfloat16):
    """Stack per-layer weights on a leading layer axis.

    Matmul weights (wqkv/wproj/wfc1/wfc2) are stored in `weight_dtype` (bf16 by
    default: half the VMEM footprint and HBM traffic, native MXU rate).  LayerNorm
    gamma/beta and all biases stay f32.  The attention scale is folded into wq.
    """
    layers = params["layers"]
    D = layers[0]["wq"].shape[0]
    hd = D // num_heads
    scale = hd ** (-0.5)

    def fuse_qkv(lp):
        wq = lp["wq"] * scale
        wk = lp["wkv"][:, :D]
        wv = lp["wkv"][:, D:]
        return jnp.concatenate([wq, wk, wv], axis=1)                          # (D, 3D)

    f32 = jnp.float32
    return {
        "ln1_w": jnp.stack([lp["ln1_w"] for lp in layers]).astype(f32),       # (L, 1, D)
        "ln1_b": jnp.stack([lp["ln1_b"] for lp in layers]).astype(f32),
        "wqkv": jnp.stack([fuse_qkv(lp) for lp in layers]).astype(weight_dtype),   # (L, D, 3D)
        "wproj": jnp.stack([lp["wproj"] for lp in layers]).astype(weight_dtype),    # (L, D, D)
        "bproj": jnp.stack([lp["bproj"] for lp in layers]).astype(f32),       # (L, 1, D)
        "ln2_w": jnp.stack([lp["ln2_w"] for lp in layers]).astype(f32),
        "ln2_b": jnp.stack([lp["ln2_b"] for lp in layers]).astype(f32),
        "wfc1": jnp.stack([lp["wfc1"] for lp in layers]).astype(weight_dtype),  # (L, D, Hm)
        "bfc1": jnp.stack([lp["bfc1"] for lp in layers]).astype(f32),         # (L, 1, Hm)
        "wfc2": jnp.stack([lp["wfc2"] for lp in layers]).astype(weight_dtype),  # (L, Hm, D)
        "bfc2": jnp.stack([lp["bfc2"] for lp in layers]).astype(f32),
    }


def _pick_vmem_limit_bytes():
    """Generation-aware VMEM budget: ~75% of physical, clamped to [32, 96] MiB."""
    try:
        cap = int(getattr(pltpu.get_tpu_info(), "vmem_capacity_bytes",
                          64 * 1024 * 1024))
    except Exception:                                                          # noqa: BLE001
        cap = 64 * 1024 * 1024
    return max(32 * 1024 * 1024, min((cap * 3) // 4, 96 * 1024 * 1024))


def transformer_mapper_forward(x, linear_w, linear_b, prefix_const, stacked, *,
                               clip_length, num_heads,
                               compute_dtype=jnp.bfloat16,
                               n_batch_blocks=1,
                               vmem_limit_bytes=None):
    B = x.shape[0]
    D = prefix_const.shape[-1]

    # Tiny input projection + prefix concat: leave to XLA (cheaper than its own dispatch).
    h = (x @ linear_w + linear_b).reshape(B, clip_length, D)
    prefix = jnp.broadcast_to(prefix_const[None], (B,) + prefix_const.shape)
    seq0 = jnp.concatenate([h, prefix], axis=1).astype(jnp.float32)           # (B, S_real, D)

    # Pad the sequence length to a multiple of 8 so the (Bblk,S,D)<->(M,D) reshapes in
    # the kernel never cross (8,128) tiles; padded keys are masked out in the kernel.
    s_real = seq0.shape[1]
    S = ((s_real + 7) // 8) * 8
    if S > s_real:
        seq0 = jnp.pad(seq0, ((0, 0), (0, S - s_real), (0, 0)))

    num_layers = stacked["wqkv"].shape[0]

    # Batch is the OUTER grid axis and weights are indexed by layer, so each extra batch
    # block re-streams the whole weight stack from HBM.  Default n_batch_blocks=1
    # (correct choice on single-TC v5e/v6e); raise to 2 on v7x only when compute-bound.
    n_bblk = n_batch_blocks if (n_batch_blocks >= 1 and B % n_batch_blocks == 0) else 1
    bblk = B // n_bblk

    if vmem_limit_bytes is None:
        vmem_limit_bytes = _pick_vmem_limit_bytes()

    def layer_spec(arr):
        nd = arr.ndim
        return pl.BlockSpec((1,) + arr.shape[1:],
                            lambda b, l, _nd=nd: (l,) + (0,) * (_nd - 1))

    kernel = functools.partial(_fused_mapper_kernel, num_heads=num_heads,
                               s_real=s_real, compute_dtype=compute_dtype)

    seq_out = pl.pallas_call(
        kernel,
        out_shape=jax.ShapeDtypeStruct((B, S, D), jnp.float32),
        grid=(n_bblk, num_layers),
        in_specs=[pl.BlockSpec((bblk, S, D), lambda b, l: (b, 0, 0))]
                 + [layer_spec(stacked[k]) for k in _STACK_ORDER],
        out_specs=pl.BlockSpec((bblk, S, D), lambda b, l: (b, 0, 0)),
        compiler_params=pltpu.CompilerParams(
            dimension_semantics=("parallel", "arbitrary"),
            vmem_limit_bytes=vmem_limit_bytes,
        ),
    )(seq0, *[stacked[k] for k in _STACK_ORDER])

    return seq_out[:, clip_length:s_real]                                     # (B, prefix_length, D)


# ------------------------------ pure-JAX reference ---------------------------


def _ref_layer(x, p, num_heads):
    D = x.shape[-1]
    hd = D // num_heads
    scale = hd ** (-0.5)

    def ln(h, w, b, eps=1e-5):
        mu = jnp.mean(h, axis=-1, keepdims=True)
        var = jnp.mean((h - mu) ** 2, axis=-1, keepdims=True)
        return (h - mu) / jnp.sqrt(var + eps) * w + b

    n1 = ln(x, p["ln1_w"][0], p["ln1_b"][0])
    q = n1 @ p["wq"]
    kv = n1 @ p["wkv"]
    k, v = kv[..., :D], kv[..., D:]
    B, S, _ = x.shape
    q = q.reshape(B, S, num_heads, hd)
    k = k.reshape(B, S, num_heads, hd)
    v = v.reshape(B, S, num_heads, hd)
    att = jnp.einsum("bnhd,bmhd->bnmh", q, k) * scale
    att = jax.nn.softmax(att, axis=2)
    out = jnp.einsum("bnmh,bmhd->bnhd", att, v).reshape(B, S, D)
    out = out @ p["wproj"] + p["bproj"][0]
    x1 = x + out
    n2 = ln(x1, p["ln2_w"][0], p["ln2_b"][0])
    m = jnp.maximum(n2 @ p["wfc1"] + p["bfc1"][0], 0.0) @ p["wfc2"] + p["bfc2"][0]
    return x1 + m


def ref_forward(x, params, *, clip_length, dim_embedding, num_heads):
    B = x.shape[0]
    h = (x @ params["linear_w"] + params["linear_b"][0]).reshape(B, clip_length, dim_embedding)
    prefix = jnp.broadcast_to(params["prefix_const"][None], (B,) + params["prefix_const"].shape)
    seq = jnp.concatenate([h, prefix], axis=1)
    for lp in params["layers"]:
        seq = _ref_layer(seq, lp, num_heads)
    return seq[:, clip_length:]


# ----------------------------------- main ------------------------------------


if __name__ == "__main__":
    # Small shapes implied by TransformerMapper(dim_clip, dim_embedding, prefix_length,
    # clip_length, num_layers) with 8 attention heads, mlp_ratio=2.0.
    B = 2
    dim_clip = 16
    dim_embedding = 32
    clip_length = 4
    prefix_length = 4
    num_layers = 2
    num_heads = 8
    mlp_hidden = int(dim_embedding * 2.0)

    def take(shape, scale=0.02):
        k, sub = jax.random.split(take.key)
        take.key = k
        return (jax.random.normal(sub, shape, dtype=jnp.float32) * scale).astype(jnp.float32)

    take.key = jax.random.PRNGKey(0)

    D, Hm = dim_embedding, mlp_hidden
    params = {
        "linear_w": take((dim_clip, clip_length * D)),
        "linear_b": take((1, clip_length * D)),
        "prefix_const": take((prefix_length, D), scale=1.0),
        "layers": [
            {
                "ln1_w": jnp.ones((1, D), jnp.float32),
                "ln1_b": jnp.zeros((1, D), jnp.float32),
                "wq": take((D, D)),
                "wkv": take((D, 2 * D)),
                "wproj": take((D, D)),
                "bproj": take((1, D)),
                "ln2_w": jnp.ones((1, D), jnp.float32),
                "ln2_b": jnp.zeros((1, D), jnp.float32),
                "wfc1": take((D, Hm)),
                "bfc1": take((1, Hm)),
                "wfc2": take((Hm, D)),
                "bfc2": take((1, D)),
            }
            for _ in range(num_layers)
        ],
    }

    x = jax.random.normal(jax.random.PRNGKey(1), (B, dim_clip), dtype=jnp.float32)

    expected = ref_forward(
        x, params, clip_length=clip_length, dim_embedding=dim_embedding, num_heads=num_heads
    )

    # ---- f32 weights / f32 matmul operands: tight numerical check. ----
    stacked_f32 = prepare_stacked_params(params, num_heads, weight_dtype=jnp.float32)
    fwd_f32 = jax.jit(functools.partial(
        transformer_mapper_forward, clip_length=clip_length, num_heads=num_heads,
        compute_dtype=jnp.float32))
    out_f32 = jax.block_until_ready(
        fwd_f32(x, params["linear_w"], params["linear_b"], params["prefix_const"], stacked_f32))
    assert out_f32.shape == (B, prefix_length, dim_embedding), out_f32.shape
    # Tolerance slightly relaxed vs 1e-4 because softmax uses the EUP approximate reciprocal.
    assert jnp.allclose(out_f32, expected, atol=1e-3, rtol=1e-3), (
        float(jnp.max(jnp.abs(out_f32 - expected))))

    # ---- Default production path: bf16 weights + bf16 matmul operands (f32 accumulation,
    # f32 LN/softmax stats / biases / residual).  Relaxed tolerance for the bf16 rounding.
    stacked_bf16 = prepare_stacked_params(params, num_heads)          # bf16 weights
    fwd_bf16 = jax.jit(functools.partial(
        transformer_mapper_forward, clip_length=clip_length, num_heads=num_heads))
    out_bf16 = jax.block_until_ready(
        fwd_bf16(x, params["linear_w"], params["linear_b"], params["prefix_const"], stacked_bf16))
    assert out_bf16.shape == (B, prefix_length, dim_embedding), out_bf16.shape
    assert jnp.allclose(out_bf16, expected, atol=5e-2, rtol=5e-2), (
        float(jnp.max(jnp.abs(out_bf16 - expected))))

    print("KERNEL_OK")
</pallas_src>

<mosaic_0001>
module attributes {stable_mosaic.version = 11 : i64} {
  func.func @_fused_mapper_kernel(%arg0: i32, %arg1: i32, %arg2: memref<2x8x32xf32, #tpu.memory_space<vmem>>, %arg3: memref<1x1x32xf32, #tpu.memory_space<vmem>>, %arg4: memref<1x1x32xf32, #tpu.memory_space<vmem>>, %arg5: memref<1x32x96xf32, #tpu.memory_space<vmem>>, %arg6: memref<1x32x32xf32, #tpu.memory_space<vmem>>, %arg7: memref<1x1x32xf32, #tpu.memory_space<vmem>>, %arg8: memref<1x1x32xf32, #tpu.memory_space<vmem>>, %arg9: memref<1x1x32xf32, #tpu.memory_space<vmem>>, %arg10: memref<1x32x64xf32, #tpu.memory_space<vmem>>, %arg11: memref<1x1x64xf32, #tpu.memory_space<vmem>>, %arg12: memref<1x64x32xf32, #tpu.memory_space<vmem>>, %arg13: memref<1x1x32xf32, #tpu.memory_space<vmem>>, %arg14: memref<2x8x32xf32, #tpu.memory_space<vmem>>) attributes {dimension_semantics = [#tpu.dimension_semantics<parallel>, #tpu.dimension_semantics<arbitrary>], iteration_bounds = array<i64: 1, 2>, scalar_prefetch = 0 : i64, scratch_operands = 0 : i64, tpu.core_type = #tpu.core_type<tc>, window_params = [{transform_indices = @transform_0, window_bounds = array<i64: 2, 8, 32>}, {transform_indices = @transform_1, window_bounds = array<i64: 1, 1, 32>}, {transform_indices = @transform_2, window_bounds = array<i64: 1, 1, 32>}, {transform_indices = @transform_3, window_bounds = array<i64: 1, 32, 96>}, {transform_indices = @transform_4, window_bounds = array<i64: 1, 32, 32>}, {transform_indices = @transform_5, window_bounds = array<i64: 1, 1, 32>}, {transform_indices = @transform_6, window_bounds = array<i64: 1, 1, 32>}, {transform_indices = @transform_7, window_bounds = array<i64: 1, 1, 32>}, {transform_indices = @transform_8, window_bounds = array<i64: 1, 32, 64>}, {transform_indices = @transform_9, window_bounds = array<i64: 1, 1, 64>}, {transform_indices = @transform_10, window_bounds = array<i64: 1, 64, 32>}, {transform_indices = @transform_11, window_bounds = array<i64: 1, 1, 32>}, {transform_indices = @transform_12, window_bounds = array<i64: 2, 8, 32>}]} {
    %c0_i32 = arith.constant 0 : i32
    %0 = arith.cmpi eq, %arg1, %c0_i32 : i32
    %1 = arith.extui %0 : i1 to i32
    %c0_i32_0 = arith.constant 0 : i32
    %2 = arith.cmpi ne, %1, %c0_i32_0 : i32
    scf.if %2 {
      %c0_85 = arith.constant 0 : index
      %c0_86 = arith.constant 0 : index
      %c0_87 = arith.constant 0 : index
      %213 = vector.load %arg2[%c0_85, %c0_86, %c0_87] : memref<2x8x32xf32, #tpu.memory_space<vmem>>, vector<2x8x32xf32>
      %c0_88 = arith.constant 0 : index
      %c0_89 = arith.constant 0 : index
      %c0_90 = arith.constant 0 : index
      %214 = vector.load %arg14[%c0_88, %c0_89, %c0_90] : memref<2x8x32xf32, #tpu.memory_space<vmem>>, vector<2x8x32xf32>
      tpu.vector_store %arg14[%c0_88, %c0_89, %c0_90], %213 {strides = array<i32>} : memref<2x8x32xf32, #tpu.memory_space<vmem>>, vector<2x8x32xf32>,
    } else {
    }
    %c0 = arith.constant 0 : index
    %c0_1 = arith.constant 0 : index
    %c0_2 = arith.constant 0 : index
    %3 = vector.load %arg14[%c0, %c0_1, %c0_2] : memref<2x8x32xf32, #tpu.memory_space<vmem>>, vector<2x8x32xf32>
    %4 = vector.shape_cast %3 : vector<2x8x32xf32> to vector<16x32xf32>
    %c0_3 = arith.constant 0 : index
    %c0_4 = arith.constant 0 : index
    %c0_5 = arith.constant 0 : index
    %5 = vector.load %arg3[%c0_3, %c0_4, %c0_5] : memref<1x1x32xf32, #tpu.memory_space<vmem>>, vector<1x1x32xf32>
    %6 = vector.shape_cast %5 : vector<1x1x32xf32> to vector<1x32xf32>
    %c0_6 = arith.constant 0 : index
    %c0_7 = arith.constant 0 : index
    %c0_8 = arith.constant 0 : index
    %7 = vector.load %arg4[%c0_6, %c0_7, %c0_8] : memref<1x1x32xf32, #tpu.memory_space<vmem>>, vector<1x1x32xf32>
    %8 = vector.shape_cast %7 : vector<1x1x32xf32> to vector<1x32xf32>
    %cst = arith.constant dense<0.000000e+00> : vector<16xf32>
    %9 = vector.multi_reduction <add>, %4, %cst [1] : vector<16x32xf32> to vector<16xf32>
    %10 = vector.shape_cast %9 : vector<16xf32> to vector<16x1xf32>
    %cst_9 = arith.constant 3.200000e+01 : f32
    %11 = vector.broadcast %cst_9 : f32 to vector<16x1xf32>
    %12 = arith.divf %10, %11 : vector<16x1xf32>
    %13 = vector.broadcast %12 : vector<16x1xf32> to vector<16x32xf32>
    %14 = arith.subf %4, %13 : vector<16x32xf32>
    %15 = arith.mulf %14, %14 : vector<16x32xf32>
    %cst_10 = arith.constant dense<0.000000e+00> : vector<16xf32>
    %16 = vector.multi_reduction <add>, %15, %cst_10 [1] : vector<16x32xf32> to vector<16xf32>
    %17 = vector.shape_cast %16 : vector<16xf32> to vector<16x1xf32>
    %cst_11 = arith.constant 3.200000e+01 : f32
    %18 = vector.broadcast %cst_11 : f32 to vector<16x1xf32>
    %19 = arith.divf %17, %18 : vector<16x1xf32>
    %20 = vector.broadcast %12 : vector<16x1xf32> to vector<16x32xf32>
    %21 = arith.subf %4, %20 : vector<16x32xf32>
    %cst_12 = arith.constant 9.99999974E-6 : f32
    %22 = vector.broadcast %cst_12 : f32 to vector<16x1xf32>
    %23 = arith.addf %19, %22 : vector<16x1xf32>
    %24 = math.rsqrt %23 : vector<16x1xf32>
    %25 = vector.broadcast %24 : vector<16x1xf32> to vector<16x32xf32>
    %26 = arith.mulf %21, %25 : vector<16x32xf32>
    %27 = vector.broadcast %6 : vector<1x32xf32> to vector<16x32xf32>
    %28 = arith.mulf %26, %27 : vector<16x32xf32>
    %29 = vector.broadcast %8 : vector<1x32xf32> to vector<16x32xf32>
    %30 = arith.addf %28, %29 : vector<16x32xf32>
    %c0_13 = arith.constant 0 : index
    %c0_14 = arith.constant 0 : index
    %c0_15 = arith.constant 0 : index
    %31 = vector.load %arg5[%c0_13, %c0_14, %c0_15] : memref<1x32x96xf32, #tpu.memory_space<vmem>>, vector<1x32x96xf32>
    %32 = vector.shape_cast %31 : vector<1x32x96xf32> to vector<32x96xf32>
    %cst_16 = arith.constant dense<0.000000e+00> : vector<16x96xf32>
    %33 = tpu.matmul %30, %32, %cst_16 {dimension_numbers = #tpu.dot_dimension_numbers<[1], [0], [0], [1], [0, 0, 1, 1], [], []>} : vector<16x32xf32>, vector<32x96xf32>, vector<16x96xf32> -> vector<16x96xf32>
    %34 = vector.shape_cast %33 : vector<16x96xf32> to vector<2x8x96xf32>
    %35 = vector.extract_strided_slice %34 {offsets = [0, 0, 0], sizes = [2, 8, 32], strides = [1, 1, 1]} : vector<2x8x96xf32> to vector<2x8x32xf32>
    %36 = vector.extract_strided_slice %34 {offsets = [0, 0, 32], sizes = [2, 8, 32], strides = [1, 1, 1]} : vector<2x8x96xf32> to vector<2x8x32xf32>
    %37 = vector.extract_strided_slice %34 {offsets = [0, 0, 64], sizes = [2, 8, 32], strides = [1, 1, 1]} : vector<2x8x96xf32> to vector<2x8x32xf32>
    %38 = vector.extract_strided_slice %35 {offsets = [0, 0, 0], sizes = [2, 8, 4], strides = [1, 1, 1]} : vector<2x8x32xf32> to vector<2x8x4xf32>
    %39 = vector.extract_strided_slice %36 {offsets = [0, 0, 0], sizes = [2, 8, 4], strides = [1, 1, 1]} : vector<2x8x32xf32> to vector<2x8x4xf32>
    %40 = vector.extract_strided_slice %37 {offsets = [0, 0, 0], sizes = [2, 8, 4], strides = [1, 1, 1]} : vector<2x8x32xf32> to vector<2x8x4xf32>
    "tpu.trace_start"() <{level = 10 : i32, message = "bnd,bmd->bnm"}> : () -> ()
    %cst_17 = arith.constant dense<0.000000e+00> : vector<2x8x8xf32>
    %41 = tpu.matmul %38, %39, %cst_17 {dimension_numbers = #tpu.dot_dimension_numbers<[2], [2], [1], [1], [0, 0, 0, 1, 1, 1], [0], [0]>} : vector<2x8x4xf32>, vector<2x8x4xf32>, vector<2x8x8xf32> -> vector<2x8x8xf32>
    "tpu.trace_stop"() : () -> ()
    %cst_18 = arith.constant dense<0xFF800000> : vector<2x8xf32>
    %42 = vector.multi_reduction <maximumf>, %41, %cst_18 [2] : vector<2x8x8xf32> to vector<2x8xf32>
    %43 = vector.shape_cast %42 : vector<2x8xf32> to vector<2x8x1xf32>
    %44 = vector.broadcast %43 : vector<2x8x1xf32> to vector<2x8x8xf32>
    %45 = arith.subf %41, %44 : vector<2x8x8xf32>
    %46 = math.exp %45 : vector<2x8x8xf32>
    %cst_19 = arith.constant dense<0.000000e+00> : vector<2x8xf32>
    %47 = vector.multi_reduction <add>, %46, %cst_19 [2] : vector<2x8x8xf32> to vector<2x8xf32>
    %48 = vector.shape_cast %47 : vector<2x8xf32> to vector<2x8x1xf32>
    %49 = tpu.reciprocal %48 {approx = true} : vector<2x8x1xf32> -> vector<2x8x1xf32>
    %50 = vector.broadcast %49 : vector<2x8x1xf32> to vector<2x8x8xf32>
    %51 = arith.mulf %46, %50 : vector<2x8x8xf32>
    "tpu.trace_start"() <{level = 10 : i32, message = "bnm,bmd->bnd"}> : () -> ()
    %cst_20 = arith.constant dense<0.000000e+00> : vector<2x8x4xf32>
    %52 = tpu.matmul %51, %40, %cst_20 {dimension_numbers = #tpu.dot_dimension_numbers<[2], [1], [1], [2], [0, 0, 0, 1, 1, 2], [0], [0]>} : vector<2x8x8xf32>, vector<2x8x4xf32>, vector<2x8x4xf32> -> vector<2x8x4xf32>
    "tpu.trace_stop"() : () -> ()
    %53 = vector.extract_strided_slice %35 {offsets = [0, 0, 4], sizes = [2, 8, 4], strides = [1, 1, 1]} : vector<2x8x32xf32> to vector<2x8x4xf32>
    %54 = vector.extract_strided_slice %36 {offsets = [0, 0, 4], sizes = [2, 8, 4], strides = [1, 1, 1]} : vector<2x8x32xf32> to vector<2x8x4xf32>
    %55 = vector.extract_strided_slice %37 {offsets = [0, 0, 4], sizes = [2, 8, 4], strides = [1, 1, 1]} : vector<2x8x32xf32> to vector<2x8x4xf32>
    "tpu.trace_start"() <{level = 10 : i32, message = "bnd,bmd->bnm"}> : () -> ()
    %cst_21 = arith.constant dense<0.000000e+00> : vector<2x8x8xf32>
    %56 = tpu.matmul %53, %54, %cst_21 {dimension_numbers = #tpu.dot_dimension_numbers<[2], [2], [1], [1], [0, 0, 0, 1, 1, 1], [0], [0]>} : vector<2x8x4xf32>, vector<2x8x4xf32>, vector<2x8x8xf32> -> vector<2x8x8xf32>
    "tpu.trace_stop"() : () -> ()
    %cst_22 = arith.constant dense<0xFF800000> : vector<2x8xf32>
    %57 = vector.multi_reduction <maximumf>, %56, %cst_22 [2] : vector<2x8x8xf32> to vector<2x8xf32>
    %58 = vector.shape_cast %57 : vector<2x8xf32> to vector<2x8x1xf32>
    %59 = vector.broadcast %58 : vector<2x8x1xf32> to vector<2x8x8xf32>
    %60 = arith.subf %56, %59 : vector<2x8x8xf32>
    %61 = math.exp %60 : vector<2x8x8xf32>
    %cst_23 = arith.constant dense<0.000000e+00> : vector<2x8xf32>
    %62 = vector.multi_reduction <add>, %61, %cst_23 [2] : vector<2x8x8xf32> to vector<2x8xf32>
    %63 = vector.shape_cast %62 : vector<2x8xf32> to vector<2x8x1xf32>
    %64 = tpu.reciprocal %63 {approx = true} : vector<2x8x1xf32> -> vector<2x8x1xf32>
    %65 = vector.broadcast %64 : vector<2x8x1xf32> to vector<2x8x8xf32>
    %66 = arith.mulf %61, %65 : vector<2x8x8xf32>
    "tpu.trace_start"() <{level = 10 : i32, message = "bnm,bmd->bnd"}> : () -> ()
    %cst_24 = arith.constant dense<0.000000e+00> : vector<2x8x4xf32>
    %67 = tpu.matmul %66, %55, %cst_24 {dimension_numbers = #tpu.dot_dimension_numbers<[2], [1], [1], [2], [0, 0, 0, 1, 1, 2], [0], [0]>} : vector<2x8x8xf32>, vector<2x8x4xf32>, vector<2x8x4xf32> -> vector<2x8x4xf32>
    "tpu.trace_stop"() : () -> ()
    %68 = vector.extract_strided_slice %35 {offsets = [0, 0, 8], sizes = [2, 8, 4], strides = [1, 1, 1]} : vector<2x8x32xf32> to vector<2x8x4xf32>
    %69 = vector.extract_strided_slice %36 {offsets = [0, 0, 8], sizes = [2, 8, 4], strides = [1, 1, 1]} : vector<2x8x32xf32> to vector<2x8x4xf32>
    %70 = vector.extract_strided_slice %37 {offsets = [0, 0, 8], sizes = [2, 8, 4], strides = [1, 1, 1]} : vector<2x8x32xf32> to vector<2x8x4xf32>
    "tpu.trace_start"() <{level = 10 : i32, message = "bnd,bmd->bnm"}> : () -> ()
    %cst_25 = arith.constant dense<0.000000e+00> : vector<2x8x8xf32>
    %71 = tpu.matmul %68, %69, %cst_25 {dimension_numbers = #tpu.dot_dimension_numbers<[2], [2], [1], [1], [0, 0, 0, 1, 1, 1], [0], [0]>} : vector<2x8x4xf32>, vector<2x8x4xf32>, vector<2x8x8xf32> -> vector<2x8x8xf32>
    "tpu.trace_stop"() : () -> ()
    %cst_26 = arith.constant dense<0xFF800000> : vector<2x8xf32>
    %72 = vector.multi_reduction <maximumf>, %71, %cst_26 [2] : vector<2x8x8xf32> to vector<2x8xf32>
    %73 = vector.shape_cast %72 : vector<2x8xf32> to vector<2x8x1xf32>
    %74 = vector.broadcast %73 : vector<2x8x1xf32> to vector<2x8x8xf32>
    %75 = arith.subf %71, %74 : vector<2x8x8xf32>
    %76 = math.exp %75 : vector<2x8x8xf32>
    %cst_27 = arith.constant dense<0.000000e+00> : vector<2x8xf32>
    %77 = vector.multi_reduction <add>, %76, %cst_27 [2] : vector<2x8x8xf32> to vector<2x8xf32>
    %78 = vector.shape_cast %77 : vector<2x8xf32> to vector<2x8x1xf32>
    %79 = tpu.reciprocal %78 {approx = true} : vector<2x8x1xf32> -> vector<2x8x1xf32>
    %80 = vector.broadcast %79 : vector<2x8x1xf32> to vector<2x8x8xf32>
    %81 = arith.mulf %76, %80 : vector<2x8x8xf32>
    "tpu.trace_start"() <{level = 10 : i32, message = "bnm,bmd->bnd"}> : () -> ()
    %cst_28 = arith.constant dense<0.000000e+00> : vector<2x8x4xf32>
    %82 = tpu.matmul %81, %70, %cst_28 {dimension_numbers = #tpu.dot_dimension_numbers<[2], [1], [1], [2], [0, 0, 0, 1, 1, 2], [0], [0]>} : vector<2x8x8xf32>, vector<2x8x4xf32>, vector<2x8x4xf32> -> vector<2x8x4xf32>
    "tpu.trace_stop"() : () -> ()
    %83 = vector.extract_strided_slice %35 {offsets = [0, 0, 12], sizes = [2, 8, 4], strides = [1, 1, 1]} : vector<2x8x32xf32> to vector<2x8x4xf32>
    %84 = vector.extract_strided_slice %36 {offsets = [0, 0, 12], sizes = [2, 8, 4], strides = [1, 1, 1]} : vector<2x8x32xf32> to vector<2x8x4xf32>
    %85 = vector.extract_strided_slice %37 {offsets = [0, 0, 12], sizes = [2, 8, 4], strides = [1, 1, 1]} : vector<2x8x32xf32> to vector<2x8x4xf32>
    "tpu.trace_start"() <{level = 10 : i32, message = "bnd,bmd->bnm"}> : () -> ()
    %cst_29 = arith.constant dense<0.000000e+00> : vector<2x8x8xf32>
    %86 = tpu.matmul %83, %84, %cst_29 {dimension_numbers = #tpu.dot_dimension_numbers<[2], [2], [1], [1], [0, 0, 0, 1, 1, 1], [0], [0]>} : vector<2x8x4xf32>, vector<2x8x4xf32>, vector<2x8x8xf32> -> vector<2x8x8xf32>
    "tpu.trace_stop"() : () -> ()
    %cst_30 = arith.constant dense<0xFF800000> : vector<2x8xf32>
    %87 = vector.multi_reduction <maximumf>, %86, %cst_30 [2] : vector<2x8x8xf32> to vector<2x8xf32>
    %88 = vector.shape_cast %87 : vector<2x8xf32> to vector<2x8x1xf32>
    %89 = vector.broadcast %88 : vector<2x8x1xf32> to vector<2x8x8xf32>
    %90 = arith.subf %86, %89 : vector<2x8x8xf32>
    %91 = math.exp %90 : vector<2x8x8xf32>
    %cst_31 = arith.constant dense<0.000000e+00> : vector<2x8xf32>
    %92 = vector.multi_reduction <add>, %91, %cst_31 [2] : vector<2x8x8xf32> to vector<2x8xf32>
    %93 = vector.shape_cast %92 : vector<2x8xf32> to vector<2x8x1xf32>
    %94 = tpu.reciprocal %93 {approx = true} : vector<2x8x1xf32> -> vector<2x8x1xf32>
    %95 = vector.broadcast %94 : vector<2x8x1xf32> to vector<2x8x8xf32>
    %96 = arith.mulf %91, %95 : vector<2x8x8xf32>
    "tpu.trace_start"() <{level = 10 : i32, message = "bnm,bmd->bnd"}> : () -> ()
    %cst_32 = arith.constant dense<0.000000e+00> : vector<2x8x4xf32>
    %97 = tpu.matmul %96, %85, %cst_32 {dimension_numbers = #tpu.dot_dimension_numbers<[2], [1], [1], [2], [0, 0, 0, 1, 1, 2], [0], [0]>} : vector<2x8x8xf32>, vector<2x8x4xf32>, vector<2x8x4xf32> -> vector<2x8x4xf32>
    "tpu.trace_stop"() : () -> ()
    %98 = vector.extract_strided_slice %35 {offsets = [0, 0, 16], sizes = [2, 8, 4], strides = [1, 1, 1]} : vector<2x8x32xf32> to vector<2x8x4xf32>
    %99 = vector.extract_strided_slice %36 {offsets = [0, 0, 16], sizes = [2, 8, 4], strides = [1, 1, 1]} : vector<2x8x32xf32> to vector<2x8x4xf32>
    %100 = vector.extract_strided_slice %37 {offsets = [0, 0, 16], sizes = [2, 8, 4], strides = [1, 1, 1]} : vector<2x8x32xf32> to vector<2x8x4xf32>
    "tpu.trace_start"() <{level = 10 : i32, message = "bnd,bmd->bnm"}> : () -> ()
    %cst_33 = arith.constant dense<0.000000e+00> : vector<2x8x8xf32>
    %101 = tpu.matmul %98, %99, %cst_33 {dimension_numbers = #tpu.dot_dimension_numbers<[2], [2], [1], [1], [0, 0, 0, 1, 1, 1], [0], [0]>} : vector<2x8x4xf32>, vector<2x8x4xf32>, vector<2x8x8xf32> -> vector<2x8x8xf32>
    "tpu.trace_stop"() : () -> ()
    %cst_34 = arith.constant dense<0xFF800000> : vector<2x8xf32>
    %102 = vector.multi_reduction <maximumf>, %101, %cst_34 [2] : vector<2x8x8xf32> to vector<2x8xf32>
    %103 = vector.shape_cast %102 : vector<2x8xf32> to vector<2x8x1xf32>
    %104 = vector.broadcast %103 : vector<2x8x1xf32> to vector<2x8x8xf32>
    %105 = arith.subf %101, %104 : vector<2x8x8xf32>
    %106 = math.exp %105 : vector<2x8x8xf32>
    %cst_35 = arith.constant dense<0.000000e+00> : vector<2x8xf32>
    %107 = vector.multi_reduction <add>, %106, %cst_35 [2] : vector<2x8x8xf32> to vector<2x8xf32>
    %108 = vector.shape_cast %107 : vector<2x8xf32> to vector<2x8x1xf32>
    %109 = tpu.reciprocal %108 {approx = true} : vector<2x8x1xf32> -> vector<2x8x1xf32>
    %110 = vector.broadcast %109 : vector<2x8x1xf32> to vector<2x8x8xf32>
    %111 = arith.mulf %106, %110 : vector<2x8x8xf32>
    "tpu.trace_start"() <{level = 10 : i32, message = "bnm,bmd->bnd"}> : () -> ()
    %cst_36 = arith.constant dense<0.000000e+00> : vector<2x8x4xf32>
    %112 = tpu.matmul %111, %100, %cst_36 {dimension_numbers = #tpu.dot_dimension_numbers<[2], [1], [1], [2], [0, 0, 0, 1, 1, 2], [0], [0]>} : vector<2x8x8xf32>, vector<2x8x4xf32>, vector<2x8x4xf32> -> vector<2x8x4xf32>
    "tpu.trace_stop"() : () -> ()
    %113 = vector.extract_strided_slice %35 {offsets = [0, 0, 20], sizes = [2, 8, 4], strides = [1, 1, 1]} : vector<2x8x32xf32> to vector<2x8x4xf32>
    %114 = vector.extract_strided_slice %36 {offsets = [0, 0, 20], sizes = [2, 8, 4], strides = [1, 1, 1]} : vector<2x8x32xf32> to vector<2x8x4xf32>
    %115 = vector.extract_strided_slice %37 {offsets = [0, 0, 20], sizes = [2, 8, 4], strides = [1, 1, 1]} : vector<2x8x32xf32> to vector<2x8x4xf32>
    "tpu.trace_start"() <{level = 10 : i32, message = "bnd,bmd->bnm"}> : () -> ()
    %cst_37 = arith.constant dense<0.000000e+00> : vector<2x8x8xf32>
    %116 = tpu.matmul %113, %114, %cst_37 {dimension_numbers = #tpu.dot_dimension_numbers<[2], [2], [1], [1], [0, 0, 0, 1, 1, 1], [0], [0]>} : vector<2x8x4xf32>, vector<2x8x4xf32>, vector<2x8x8xf32> -> vector<2x8x8xf32>
    "tpu.trace_stop"() : () -> ()
    %cst_38 = arith.constant dense<0xFF800000> : vector<2x8xf32>
    %117 = vector.multi_reduction <maximumf>, %116, %cst_38 [2] : vector<2x8x8xf32> to vector<2x8xf32>
    %118 = vector.shape_cast %117 : vector<2x8xf32> to vector<2x8x1xf32>
    %119 = vector.broadcast %118 : vector<2x8x1xf32> to vector<2x8x8xf32>
    %120 = arith.subf %116, %119 : vector<2x8x8xf32>
    %121 = math.exp %120 : vector<2x8x8xf32>
    %cst_39 = arith.constant dense<0.000000e+00> : vector<2x8xf32>
    %122 = vector.multi_reduction <add>, %121, %cst_39 [2] : vector<2x8x8xf32> to vector<2x8xf32>
    %123 = vector.shape_cast %122 : vector<2x8xf32> to vector<2x8x1xf32>
    %124 = tpu.reciprocal %123 {approx = true} : vector<2x8x1xf32> -> vector<2x8x1xf32>
    %125 = vector.broadcast %124 : vector<2x8x1xf32> to vector<2x8x8xf32>
    %126 = arith.mulf %121, %125 : vector<2x8x8xf32>
    "tpu.trace_start"() <{level = 10 : i32, message = "bnm,bmd->bnd"}> : () -> ()
    %cst_40 = arith.constant dense<0.000000e+00> : vector<2x8x4xf32>
    %127 = tpu.matmul %126, %115, %cst_40 {dimension_numbers = #tpu.dot_dimension_numbers<[2], [1], [1], [2], [0, 0, 0, 1, 1, 2], [0], [0]>} : vector<2x8x8xf32>, vector<2x8x4xf32>, vector<2x8x4xf32> -> vector<2x8x4xf32>
    "tpu.trace_stop"() : () -> ()
    %128 = vector.extract_strided_slice %35 {offsets = [0, 0, 24], sizes = [2, 8, 4], strides = [1, 1, 1]} : vector<2x8x32xf32> to vector<2x8x4xf32>
    %129 = vector.extract_strided_slice %36 {offsets = [0, 0, 24], sizes = [2, 8, 4], strides = [1, 1, 1]} : vector<2x8x32xf32> to vector<2x8x4xf32>
    %130 = vector.extract_strided_slice %37 {offsets = [0, 0, 24], sizes = [2, 8, 4], strides = [1, 1, 1]} : vector<2x8x32xf32> to vector<2x8x4xf32>
    "tpu.trace_start"() <{level = 10 : i32, message = "bnd,bmd->bnm"}> : () -> ()
    %cst_41 = arith.constant dense<0.000000e+00> : vector<2x8x8xf32>
    %131 = tpu.matmul %128, %129, %cst_41 {dimension_numbers = #tpu.dot_dimension_numbers<[2], [2], [1], [1], [0, 0, 0, 1, 1, 1], [0], [0]>} : vector<2x8x4xf32>, vector<2x8x4xf32>, vector<2x8x8xf32> -> vector<2x8x8xf32>
    "tpu.trace_stop"() : () -> ()
    %cst_42 = arith.constant dense<0xFF800000> : vector<2x8xf32>
    %132 = vector.multi_reduction <maximumf>, %131, %cst_42 [2] : vector<2x8x8xf32> to vector<2x8xf32>
    %133 = vector.shape_cast %132 : vector<2x8xf32> to vector<2x8x1xf32>
    %134 = vector.broadcast %133 : vector<2x8x1xf32> to vector<2x8x8xf32>
    %135 = arith.subf %131, %134 : vector<2x8x8xf32>
    %136 = math.exp %135 : vector<2x8x8xf32>
    %cst_43 = arith.constant dense<0.000000e+00> : vector<2x8xf32>
    %137 = vector.multi_reduction <add>, %136, %cst_43 [2] : vector<2x8x8xf32> to vector<2x8xf32>
    %138 = vector.shape_cast %137 : vector<2x8xf32> to vector<2x8x1xf32>
    %139 = tpu.reciprocal %138 {approx = true} : vector<2x8x1xf32> -> vector<2x8x1xf32>
    %140 = vector.broadcast %139 : vector<2x8x1xf32> to vector<2x8x8xf32>
    %141 = arith.mulf %136, %140 : vector<2x8x8xf32>
    "tpu.trace_start"() <{level = 10 : i32, message = "bnm,bmd->bnd"}> : () -> ()
    %cst_44 = arith.constant dense<0.000000e+00> : vector<2x8x4xf32>
    %142 = tpu.matmul %141, %130, %cst_44 {dimension_numbers = #tpu.dot_dimension_numbers<[2], [1], [1], [2], [0, 0, 0, 1, 1, 2], [0], [0]>} : vector<2x8x8xf32>, vector<2x8x4xf32>, vector<2x8x4xf32> -> vector<2x8x4xf32>
    "tpu.trace_stop"() : () -> ()
    %143 = vector.extract_strided_slice %35 {offsets = [0, 0, 28], sizes = [2, 8, 4], strides = [1, 1, 1]} : vector<2x8x32xf32> to vector<2x8x4xf32>
    %144 = vector.extract_strided_slice %36 {offsets = [0, 0, 28], sizes = [2, 8, 4], strides = [1, 1, 1]} : vector<2x8x32xf32> to vector<2x8x4xf32>
    %145 = vector.extract_strided_slice %37 {offsets = [0, 0, 28], sizes = [2, 8, 4], strides = [1, 1, 1]} : vector<2x8x32xf32> to vector<2x8x4xf32>
    "tpu.trace_start"() <{level = 10 : i32, message = "bnd,bmd->bnm"}> : () -> ()
    %cst_45 = arith.constant dense<0.000000e+00> : vector<2x8x8xf32>
    %146 = tpu.matmul %143, %144, %cst_45 {dimension_numbers = #tpu.dot_dimension_numbers<[2], [2], [1], [1], [0, 0, 0, 1, 1, 1], [0], [0]>} : vector<2x8x4xf32>, vector<2x8x4xf32>, vector<2x8x8xf32> -> vector<2x8x8xf32>
    "tpu.trace_stop"() : () -> ()
    %cst_46 = arith.constant dense<0xFF800000> : vector<2x8xf32>
    %147 = vector.multi_reduction <maximumf>, %146, %cst_46 [2] : vector<2x8x8xf32> to vector<2x8xf32>
    %148 = vector.shape_cast %147 : vector<2x8xf32> to vector<2x8x1xf32>
    %149 = vector.broadcast %148 : vector<2x8x1xf32> to vector<2x8x8xf32>
    %150 = arith.subf %146, %149 : vector<2x8x8xf32>
    %151 = math.exp %150 : vector<2x8x8xf32>
    %cst_47 = arith.constant dense<0.000000e+00> : vector<2x8xf32>
    %152 = vector.multi_reduction <add>, %151, %cst_47 [2] : vector<2x8x8xf32> to vector<2x8xf32>
    %153 = vector.shape_cast %152 : vector<2x8xf32> to vector<2x8x1xf32>
    %154 = tpu.reciprocal %153 {approx = true} : vector<2x8x1xf32> -> vector<2x8x1xf32>
    %155 = vector.broadcast %154 : vector<2x8x1xf32> to vector<2x8x8xf32>
    %156 = arith.mulf %151, %155 : vector<2x8x8xf32>
    "tpu.trace_start"() <{level = 10 : i32, message = "bnm,bmd->bnd"}> : () -> ()
    %cst_48 = arith.constant dense<0.000000e+00> : vector<2x8x4xf32>
    %157 = tpu.matmul %156, %145, %cst_48 {dimension_numbers = #tpu.dot_dimension_numbers<[2], [1], [1], [2], [0, 0, 0, 1, 1, 2], [0], [0]>} : vector<2x8x8xf32>, vector<2x8x4xf32>, vector<2x8x4xf32> -> vector<2x8x4xf32>
    "tpu.trace_stop"() : () -> ()
    %158 = tpu.concatenate %52, %67, %82, %97, %112, %127, %142, %157 in 2 : vector<2x8x4xf32>, vector<2x8x4xf32>, vector<2x8x4xf32>, vector<2x8x4xf32>, vector<2x8x4xf32>, vector<2x8x4xf32>, vector<2x8x4xf32>, vector<2x8x4xf32> -> vector<2x8x32xf32>
    %159 = vector.shape_cast %158 : vector<2x8x32xf32> to vector<16x32xf32>
    %c0_49 = arith.constant 0 : index
    %c0_50 = arith.constant 0 : index
    %c0_51 = arith.constant 0 : index
    %160 = vector.load %arg6[%c0_49, %c0_50, %c0_51] : memref<1x32x32xf32, #tpu.memory_space<vmem>>, vector<1x32x32xf32>
    %161 = vector.shape_cast %160 : vector<1x32x32xf32> to vector<32x32xf32>
    %cst_52 = arith.constant dense<0.000000e+00> : vector<16x32xf32>
    %162 = tpu.matmul %159, %161, %cst_52 {dimension_numbers = #tpu.dot_dimension_numbers<[1], [0], [0], [1], [0, 0, 1, 1], [], []>} : vector<16x32xf32>, vector<32x32xf32>, vector<16x32xf32> -> vector<16x32xf32>
    %c0_53 = arith.constant 0 : index
    %c0_54 = arith.constant 0 : index
    %c0_55 = arith.constant 0 : index
    %163 = vector.load %arg7[%c0_53, %c0_54, %c0_55] : memref<1x1x32xf32, #tpu.memory_space<vmem>>, vector<1x1x32xf32>
    %164 = vector.shape_cast %163 : vector<1x1x32xf32> to vector<1x32xf32>
    %165 = vector.broadcast %164 : vector<1x32xf32> to vector<16x32xf32>
    %166 = arith.addf %162, %165 : vector<16x32xf32>
    %167 = arith.addf %4, %166 : vector<16x32xf32>
    %c0_56 = arith.constant 0 : index
    %c0_57 = arith.constant 0 : index
    %c0_58 = arith.constant 0 : index
    %168 = vector.load %arg8[%c0_56, %c0_57, %c0_58] : memref<1x1x32xf32, #tpu.memory_space<vmem>>, vector<1x1x32xf32>
    %169 = vector.shape_cast %168 : vector<1x1x32xf32> to vector<1x32xf32>
    %c0_59 = arith.constant 0 : index
    %c0_60 = arith.constant 0 : index
    %c0_61 = arith.constant 0 : index
    %170 = vector.load %arg9[%c0_59, %c0_60, %c0_61] : memref<1x1x32xf32, #tpu.memory_space<vmem>>, vector<1x1x32xf32>
    %171 = vector.shape_cast %170 : vector<1x1x32xf32> to vector<1x32xf32>
    %cst_62 = arith.constant dense<0.000000e+00> : vector<16xf32>
    %172 = vector.multi_reduction <add>, %167, %cst_62 [1] : vector<16x32xf32> to vector<16xf32>
    %173 = vector.shape_cast %172 : vector<16xf32> to vector<16x1xf32>
    %cst_63 = arith.constant 3.200000e+01 : f32
    %174 = vector.broadcast %cst_63 : f32 to vector<16x1xf32>
    %175 = arith.divf %173, %174 : vector<16x1xf32>
    %176 = vector.broadcast %175 : vector<16x1xf32> to vector<16x32xf32>
    %177 = arith.subf %167, %176 : vector<16x32xf32>
    %178 = arith.mulf %177, %177 : vector<16x32xf32>
    %cst_64 = arith.constant dense<0.000000e+00> : vector<16xf32>
    %179 = vector.multi_reduction <add>, %178, %cst_64 [1] : vector<16x32xf32> to vector<16xf32>
    %180 = vector.shape_cast %179 : vector<16xf32> to vector<16x1xf32>
    %cst_65 = arith.constant 3.200000e+01 : f32
    %181 = vector.broadcast %cst_65 : f32 to vector<16x1xf32>
    %182 = arith.divf %180, %181 : vector<16x1xf32>
    %183 = vector.broadcast %175 : vector<16x1xf32> to vector<16x32xf32>
    %184 = arith.subf %167, %183 : vector<16x32xf32>
    %cst_66 = arith.constant 9.99999974E-6 : f32
    %185 = vector.broadcast %cst_66 : f32 to vector<16x1xf32>
    %186 = arith.addf %182, %185 : vector<16x1xf32>
    %187 = math.rsqrt %186 : vector<16x1xf32>
    %188 = vector.broadcast %187 : vector<16x1xf32> to vector<16x32xf32>
    %189 = arith.mulf %184, %188 : vector<16x32xf32>
    %190 = vector.broadcast %169 : vector<1x32xf32> to vector<16x32xf32>
    %191 = arith.mulf %189, %190 : vector<16x32xf32>
    %192 = vector.broadcast %171 : vector<1x32xf32> to vector<16x32xf32>
    %193 = arith.addf %191, %192 : vector<16x32xf32>
    %c0_67 = arith.constant 0 : index
    %c0_68 = arith.constant 0 : index
    %c0_69 = arith.constant 0 : index
    %194 = vector.load %arg10[%c0_67, %c0_68, %c0_69] : memref<1x32x64xf32, #tpu.memory_space<vmem>>, vector<1x32x64xf32>
    %195 = vector.shape_cast %194 : vector<1x32x64xf32> to vector<32x64xf32>
    %cst_70 = arith.constant dense<0.000000e+00> : vector<16x64xf32>
    %196 = tpu.matmul %193, %195, %cst_70 {dimension_numbers = #tpu.dot_dimension_numbers<[1], [0], [0], [1], [0, 0, 1, 1], [], []>} : vector<16x32xf32>, vector<32x64xf32>, vector<16x64xf32> -> vector<16x64xf32>
    %c0_71 = arith.constant 0 : index
    %c0_72 = arith.constant 0 : index
    %c0_73 = arith.constant 0 : index
    %197 = vector.load %arg11[%c0_71, %c0_72, %c0_73] : memref<1x1x64xf32, #tpu.memory_space<vmem>>, vector<1x1x64xf32>
    %198 = vector.shape_cast %197 : vector<1x1x64xf32> to vector<1x64xf32>
    %199 = vector.broadcast %198 : vector<1x64xf32> to vector<16x64xf32>
    %200 = arith.addf %196, %199 : vector<16x64xf32>
    %cst_74 = arith.constant 0.000000e+00 : f32
    %201 = vector.broadcast %cst_74 : f32 to vector<16x64xf32>
    %202 = arith.maximumf %200, %201 : vector<16x64xf32>
    %c0_75 = arith.constant 0 : index
    %c0_76 = arith.constant 0 : index
    %c0_77 = arith.constant 0 : index
    %203 = vector.load %arg12[%c0_75, %c0_76, %c0_77] : memref<1x64x32xf32, #tpu.memory_space<vmem>>, vector<1x64x32xf32>
    %204 = vector.shape_cast %203 : vector<1x64x32xf32> to vector<64x32xf32>
    %cst_78 = arith.constant dense<0.000000e+00> : vector<16x32xf32>
    %205 = tpu.matmul %202, %204, %cst_78 {dimension_numbers = #tpu.dot_dimension_numbers<[1], [0], [0], [1], [0, 0, 1, 1], [], []>} : vector<16x64xf32>, vector<64x32xf32>, vector<16x32xf32> -> vector<16x32xf32>
    %c0_79 = arith.constant 0 : index
    %c0_80 = arith.constant 0 : index
    %c0_81 = arith.constant 0 : index
    %206 = vector.load %arg13[%c0_79, %c0_80, %c0_81] : memref<1x1x32xf32, #tpu.memory_space<vmem>>, vector<1x1x32xf32>
    %207 = vector.shape_cast %206 : vector<1x1x32xf32> to vector<1x32xf32>
    %208 = vector.broadcast %207 : vector<1x32xf32> to vector<16x32xf32>
    %209 = arith.addf %205, %208 : vector<16x32xf32>
    %210 = arith.addf %167, %209 : vector<16x32xf32>
    %211 = vector.shape_cast %210 : vector<16x32xf32> to vector<2x8x32xf32>
    %c0_82 = arith.constant 0 : index
    %c0_83 = arith.constant 0 : index
    %c0_84 = arith.constant 0 : index
    %212 = vector.load %arg14[%c0_82, %c0_83, %c0_84] : memref<2x8x32xf32, #tpu.memory_space<vmem>>, vector<2x8x32xf32>
    tpu.vector_store %arg14[%c0_82, %c0_83, %c0_84], %211 {strides = array<i32>} : memref<2x8x32xf32, #tpu.memory_space<vmem>>, vector<2x8x32xf32>,
    return
  }
  func.func @transform_0(%arg0: i32, %arg1: i32) -> (i32, i32, i32) {
    %c0_i32 = arith.constant 0 : i32
    %c0_i32_0 = arith.constant 0 : i32
    %c0_i32_1 = arith.constant 0 : i32
    return %arg0, %c0_i32, %c0_i32_0 : i32, i32, i32
  }
  func.func @transform_1(%arg0: i32, %arg1: i32) -> (i32, i32, i32) {
    %c0_i32 = arith.constant 0 : i32
    %c0_i32_0 = arith.constant 0 : i32
    %c0_i32_1 = arith.constant 0 : i32
    return %arg1, %c0_i32, %c0_i32_0 : i32, i32, i32
  }
  func.func @transform_2(%arg0: i32, %arg1: i32) -> (i32, i32, i32) {
    %c0_i32 = arith.constant 0 : i32
    %c0_i32_0 = arith.constant 0 : i32
    %c0_i32_1 = arith.constant 0 : i32
    return %arg1, %c0_i32, %c0_i32_0 : i32, i32, i32
  }
  func.func @transform_3(%arg0: i32, %arg1: i32) -> (i32, i32, i32) {
    %c0_i32 = arith.constant 0 : i32
    %c0_i32_0 = arith.constant 0 : i32
    %c0_i32_1 = arith.constant 0 : i32
    return %arg1, %c0_i32, %c0_i32_0 : i32, i32, i32
  }
  func.func @transform_4(%arg0: i32, %arg1: i32) -> (i32, i32, i32) {
    %c0_i32 = arith.constant 0 : i32
    %c0_i32_0 = arith.constant 0 : i32
    %c0_i32_1 = arith.constant 0 : i32
    return %arg1, %c0_i32, %c0_i32_0 : i32, i32, i32
  }
  func.func @transform_5(%arg0: i32, %arg1: i32) -> (i32, i32, i32) {
    %c0_i32 = arith.constant 0 : i32
    %c0_i32_0 = arith.constant 0 : i32
    %c0_i32_1 = arith.constant 0 : i32
    return %arg1, %c0_i32, %c0_i32_0 : i32, i32, i32
  }
  func.func @transform_6(%arg0: i32, %arg1: i32) -> (i32, i32, i32) {
    %c0_i32 = arith.constant 0 : i32
    %c0_i32_0 = arith.constant 0 : i32
    %c0_i32_1 = arith.constant 0 : i32
    return %arg1, %c0_i32, %c0_i32_0 : i32, i32, i32
  }
  func.func @transform_7(%arg0: i32, %arg1: i32) -> (i32, i32, i32) {
    %c0_i32 = arith.constant 0 : i32
    %c0_i32_0 = arith.constant 0 : i32
    %c0_i32_1 = arith.constant 0 : i32
    return %arg1, %c0_i32, %c0_i32_0 : i32, i32, i32
  }
  func.func @transform_8(%arg0: i32, %arg1: i32) -> (i32, i32, i32) {
    %c0_i32 = arith.constant 0 : i32
    %c0_i32_0 = arith.constant 0 : i32
    %c0_i32_1 = arith.constant 0 : i32
    return %arg1, %c0_i32, %c0_i32_0 : i32, i32, i32
  }
  func.func @transform_9(%arg0: i32, %arg1: i32) -> (i32, i32, i32) {
    %c0_i32 = arith.constant 0 : i32
    %c0_i32_0 = arith.constant 0 : i32
    %c0_i32_1 = arith.constant 0 : i32
    return %arg1, %c0_i32, %c0_i32_0 : i32, i32, i32
  }
  func.func @transform_10(%arg0: i32, %arg1: i32) -> (i32, i32, i32) {
    %c0_i32 = arith.constant 0 : i32
    %c0_i32_0 = arith.constant 0 : i32
    %c0_i32_1 = arith.constant 0 : i32
    return %arg1, %c0_i32, %c0_i32_0 : i32, i32, i32
  }
  func.func @transform_11(%arg0: i32, %arg1: i32) -> (i32, i32, i32) {
    %c0_i32 = arith.constant 0 : i32
    %c0_i32_0 = arith.constant 0 : i32
    %c0_i32_1 = arith.constant 0 : i32
    return %arg1, %c0_i32, %c0_i32_0 : i32, i32, i32
  }
  func.func @transform_12(%arg0: i32, %arg1: i32) -> (i32, i32, i32) {
    %c0_i32 = arith.constant 0 : i32
    %c0_i32_0 = arith.constant 0 : i32
    %c0_i32_1 = arith.constant 0 : i32
    return %arg0, %c0_i32, %c0_i32_0 : i32, i32, i32
  }
}

</mosaic_0001>

<bundles_post_ra>
// kernel: transformer_mapper_forward.1
= control target key start
LH: loop header
LB: loop body
LE: loop exit
PB: predicated region body
PF: predicated region fallthrough
CT: control target
= control target key end

     0   :  { %s4613_s21 = smov 0   ;;  %s4615_s22 = smov 0   ;;  %s5073_s0 = inlined_call_operand.vmem [shape: f32[2,8,32], index: 0, kind: input, shape index: {}]   ;;  %s5074_s1 = inlined_call_operand.vmem [shape: f32[2,1,32], index: 1, kind: input, shape index: {}]   ;;  %s5075_s2 = inlined_call_operand.vmem [shape: f32[2,1,32], index: 2, kind: input, shape index: {}]   ;;  %s5076_s3 = inlined_call_operand.vmem [shape: f32[2,32,96], index: 3, kind: input, shape index: {}]   ;;  %s5077_s4 = inlined_call_operand.vmem [shape: f32[2,32,32], index: 4, kind: input, shape index: {}]   ;;  %s5078_s5 = inlined_call_operand.vmem [shape: f32[2,1,32], index: 5, kind: input, shape index: {}]   ;;  %s5079_s6 = inlined_call_operand.vmem [shape: f32[2,1,32], index: 6, kind: input, shape index: {}]   ;;  %s5080_s7 = inlined_call_operand.vmem [shape: f32[2,1,32], index: 7, kind: input, shape index: {}]   ;;  %s5081_s8 = inlined_call_operand.vmem [shape: f32[2,32,64], index: 8, kind: input, shape index: {}]   ;;  %s5082_s9 = inlined_call_operand.vmem [shape: f32[2,1,64], index: 9, kind: input, shape index: {}]   ;;  %s5083_s10 = inlined_call_operand.vmem [shape: f32[2,64,32], index: 10, kind: input, shape index: {}]   ;;  %s5084_s11 = inlined_call_operand.vmem [shape: f32[2,1,32], index: 11, kind: input, shape index: {}]   ;;  %s5085_s12 = inlined_call_operand.vmem [shape: f32[2,8,32], index: 12, kind: output, shape index: {}]  }
   0x1   :  { %5088 = sst [smem:[#allocation5_spill]] %s5076_s3  ;;  %s4617_s23 = smov 0  }
   0x2   :  { %5089 = sst [smem:[#allocation6_spill]] %s5077_s4 }
   0x3   :  { %5090 = sst [smem:[#allocation7_spill]] %s5078_s5 }
   0x4 LB: > { %5091 = sst [smem:[#allocation2_spill]] %s4510_s22  ;;  %s31_s24 = sadd.s32 1, %s4510_s22  ;;  %s4514_s23 = sphi %s4617_s23, %s22_s23   ;;  %s4510_s22 = sphi %s4615_s22, %s5104_s22   ;;  %s4506_s21 = sphi %s4613_s21, %s5103_s21  }
   0x5   : > { %5092 = sst [smem:[#allocation3_spill]] %s4514_s23  ;;  %p3977_p0 = scmp.ge.s32.totalorder %s4514_s23, 1 }
   0x6   : > { %p32_p1 = scmp.ge.s32.totalorder %s31_s24, 2  ;;  %p471_p2 = scmp.lt.s32.totalorder %s4514_s23, 3 }
   0x8   : > { %s5106_s24 = smov (%p32_p1, %s31_s24), 0  ;;  %p472_p3 = pnand %p3977_p0, %p471_p2 }
   0x9   : > { %5093 = sst [smem:[#allocation4_spill]] %s5106_s24  ;;  %p560_p4 = scmp.lt.s32.totalorder (!%p472_p3), %s4506_s21, 1 }
   0xa   : > { %475 = sbr.rel (%p472_p3) target bundleno = 5952 (0x1740), region = 68  ;;  %s5095_s3 = sld [smem:[#allocation5_spill]] (!%p472_p3) }
   0xb   : > { %s5096_s4 = sld [smem:[#allocation6_spill]] (!%p472_p3)  ;;  %p3986_p5 = scmp.ne.s32.totalorder (!%p472_p3), %s4506_s21, 0 }
   0xf   : > { %s4631_s25 = scalar_select %p560_p4, %s4506_s21, 1 }
  0x11   : > { %s4054_s14 = sshll.u32 %s4631_s25, 5  ;;  %s584_s23 = scalar_lea.vmem %s5080_s7, %s4631_s25 }
  0x12   : > { %s4649_s20 = scalar_lea.vmem %s5095_s3, %s4054_s14  ;;  %s4654_s24 = scalar_lea.vmem %s5096_s4, %s4054_s14 }
  0x13   : > { %s4667_s17 = scalar_lea.vmem %s5081_s8, %s4054_s14  ;;  %s592_s3 = scalar_lea.vmem %s5082_s9, %s4631_s25 }
  0x14   : > { %s4057_s26 = sshll.u32 %s4631_s25, 6  ;;  %s600_s5 = scalar_lea.vmem %s5084_s11, %s4631_s25 }
  0x15   : > { %s4681_s29 = scalar_lea.vmem %s5083_s10, %s4057_s26  ;;  %610 = sbr.rel (%p3986_p5) target bundleno = 28 (0x1c), region = 72 }
  0x1a   : > { %v611_v0 = vld [vmem:[%s5073_s0] sm:$0xff]  ;;  %vm613_vm0 = vcmask 261120   ;;  %v612_v1 = vld [vmem:[%s5073_s0 + $0x8] sm:$0xff] }
  0x1b   : > { %614 = vst.msk [vmem:[%s5085_s12] sm:$0xff] %vm613_vm0, %v611_v0  ;;  %615 = vst.msk [vmem:[%s5085_s12 + $0x8] sm:$0xff] %vm613_vm0, %v612_v1 }
  0x1c PF: > { %vm620_vm1 = vcmask 261120   ;;  %v667_v16 = vld [vmem:[%s4649_s20 + $0x18] sm:$0xff]  ;;  %v666_v17 = vld [vmem:[%s4649_s20 + $0x10] sm:$0xff]  ;;  %v665_v18 = vld [vmem:[%s4649_s20 + $0x8] sm:$0xff]  ;;  %s5097_s30 = scalar_lea.vmem %s5074_s1, %s4631_s25  ;;  %v4516_v36 = vmov 0.0   ;;  %vm4517_vm2 = vmmov 0  }
  0x1d   : > { %4150 = vmatprep.subr.mxu1 %v667_v16  ;;  %v664_v19 = vld [vmem:[%s4649_s20] sm:$0xff]  ;;  %s5098_s20 = scalar_lea.vmem %s5075_s2, %s4631_s25  ;;  %4171 = vmatprep.subr.mxu0 %v4516_v36  ;;  %s4518_s16 = smov 96   ;;  %vm752_vm3 = vcmask 31744   ;;  %vm904_vm4 = vcmask 64512   ;;  %vm3449_vm5 = vcmask 97280   ;;  %vm3452_vm6 = vcmask 130048  }
  0x1e   : > { %4151 = vmatpush3.msra.mxu1 %v667_v16  ;;  %v3987_v27 = vld [vmem:[%s5097_s30] ss:$0 sm:$0xff]  ;;  %4173 = vmatprep.mubr.msk.f32.mxu0 %vm4517_vm2, %v4516_v36  ;;  %s4519_s18 = smov 64   ;;  %s4520_s4 = smov 92   ;;  %vm3455_vm7 = vcmask 162816   ;;  %vm3461_vm8 = vcmask 228352  }
  0x1f   : > { %4152 = vmatprep.subr.mxu1 %v666_v17  ;;  %v3988_v29 = vld [vmem:[%s5098_s20] ss:$0 sm:$0xff]  ;;  %s4521_s19 = smov 124   ;;  %s4522_s21 = smov 60   ;;  %vm3458_vm9 = vcmask 195584   ;;  %vm3711_vm10 = vcmask 523264  }
  0x20   : > { %4153 = vmatpush3.msra.mxu1 %v666_v17  ;;  %s4523_s26 = smov 88   ;;  %s4524_s27 = smov 120  }
  0x21   : > { %4154 = vmatprep.subr.mxu1 %v665_v18  ;;  %s4525_s22 = smov 56   ;;  %s4526_s28 = smov 84  }
  0x22   : > { %v616_v2 = vld [vmem:[%s5085_s12] sm:$0xff]  ;;  %v617_v3 = vld [vmem:[%s5085_s12 + $0x8] sm:$0xff]  ;;  %4155 = vmatpush3.msra.mxu1 %v665_v18  ;;  %s4527_s13 = smov 116   ;;  %s4528_s30 = smov 52  }
  0x23   : > { %v621_v4 = vsel %vm620_vm1, %v616_v2, 0.0  ;;  %v624_v5 = vsel %vm620_vm1, %v617_v3, 0.0  ;;  %4156 = vmatprep.subr.mxu1 %v664_v19  ;;  %s4529_s14 = smov 80   ;;  %s4530_s15 = smov 112  }
  0x24   : > { %622 = vadd.xlane.f32.xlu0 %v621_v4  ;;  %4157 = vmatpush3.msra.mxu1 %v664_v19  ;;  %s4531_s20 = smov 48  }
  0x25   : > { %4161 = vmatprep.subr.mxu1 %v4516_v36 }
  0x28   : > { %625 = vadd.xlane.f32.xlu0 %v624_v5 }
  0xad   : > { %v623_v6 = vpop.xlane.xlu0 %622 }
  0xae   : > { %v628_v7 = vmul.f32 0.03125, %v623_v6 }
  0xb0   : > { %v630_v8 = vsub.f32 %v616_v2, %v628_v7 }
  0xb1   : > { %v626_v9 = vpop.xlane.xlu0 %625 }
  0xb2   : > { %v629_v10 = vmul.f32 0.03125, %v626_v9  ;;  %v632_v11 = vmul.f32 %v630_v8, %v630_v8 }
  0xb4   : > { %v631_v12 = vsub.f32 %v617_v3, %v629_v10  ;;  %v634_v13 = vsel %vm620_vm1, %v632_v11, 0.0 }
  0xb5   : > { %635 = vadd.xlane.f32.xlu1 %v634_v13 }
  0xb6   : > { %v633_v14 = vmul.f32 %v631_v12, %v631_v12 }
  0xb8   : > { %v637_v15 = vsel %vm620_vm1, %v633_v14, 0.0 }
  0xb9   : > { %638 = vadd.xlane.f32.xlu1 %v637_v15 }
 0x13e   : > { %v636_v20 = vpop.xlane.xlu1 %635 }
 0x13f   : > { %v640_v21 = vmul.f32 0.03125, %v636_v20 }
 0x141   : > { %v642_v22 = vadd.f32 1e-05, %v640_v21 }
 0x142   : > { %v639_v23 = vpop.xlane.xlu1 %638 }
 0x143   : > { %4418 = vrsqrt.f32 %v642_v22  ;;  %v641_v24 = vmul.f32 0.03125, %v639_v23 }
 0x145   : > { %v643_v25 = vadd.f32 1e-05, %v641_v24 }
 0x147   : > { %4420 = vrsqrt.f32 %v643_v25 }
 0x150   : > { %v4419_v26 = vpop.eup %4418 }
 0x151   : > { %v646_v28 = vmul.f32 %v4419_v26, %v630_v8 }
 0x153   : > { %v654_v30 = vmul.f32 %v3987_v27, %v646_v28 }
 0x154   : > { %v4421_v31 = vpop.eup %4420 }
 0x155   : > { %v647_v32 = vmul.f32 %v4421_v31, %v631_v12  ;;  %v662_v33 = vadd.f32 %v3988_v29, %v654_v30 }
 0x157   : > { %v655_v34 = vmul.f32 %v3987_v27, %v647_v32  ;;  %4158 = vmatprep.mubr.msk.f32.mxu1 %vm620_vm1, %v662_v33 }
 0x159   : > { %v663_v35 = vadd.f32 %v3988_v29, %v655_v34 }
 0x15b   : > { %4159 = vmatmul.mubr.msk.f32.vlgmr.msra.gmra.mxu1 %vm620_vm1, %v663_v35 }
 0x15c   : > { %4163 = vmatprep.mubr.msk.f32.mxu1 %vm4517_vm2, %v4516_v36 }
 0x21b   : > { %v4727_v37 = vpop.f32.mrf.mxu1 }
 0x21c   : > { %828 = vrot.lane.b32.xlu1 %v4727_v37, %s4518_s16 }
 0x21d   : > { %v4730_v38 = vpop.f32.mrf.mxu1 }
 0x21e   : > { %750 = vrot.lane.b32.xlu0 %v4730_v38, %s4518_s16  ;;  %s4532_s16 = smov 76  }
 0x28e   : > { %v829_v40 = vpop.permute.xlu1 %828 }
 0x290   : > { %v751_v39 = vpop.permute.xlu0 %750 }
 0x291   : > { %4162 = vmatpush3.xpose.msk.msra.mxu1 %vm752_vm3, %v751_v39 }
 0x292   : > { %4166 = vmatprep.subr.mxu1 %v4516_v36 }
 0x294   : > { %4164 = vmatmul.mubr.msk.f32.vlgmr.msra.gmra.mxu1 %vm752_vm3, %v4730_v38 }
 0x295   : > { %4167 = vmatpush3.xpose.msk.msra.mxu1 %vm752_vm3, %v829_v40  ;;  %4168 = vmatprep.mubr.msk.f32.mxu1 %vm4517_vm2, %v4516_v36 }
 0x296   : > { %4176 = vmatprep.subr.mxu1 %v4516_v36 }
 0x298   : > { %4169 = vmatmul.mubr.msk.f32.vlgmr.msra.gmra.mxu1 %vm752_vm3, %v4727_v37 }
 0x299   : > { %4178 = vmatprep.mubr.msk.f32.mxu1 %vm4517_vm2, %v4516_v36 }
 0x354   : > { %v823_v41 = vpop.f32.mrf.mxu1 }
 0x355   : > { %v905_v42 = vsel %vm904_vm4, %v823_v41, -inf }
 0x356   : > { %906 = vmax.xlane.f32.xlu1 %v905_v42  ;;  %v4165_v43 = vpop.f32.mrf.mxu1 }
 0x358   : > { %v900_v44 = vpop.f32.mrf.mxu1 }
 0x359   : > { %v908_v45 = vsel %vm904_vm4, %v900_v44, -inf }
 0x35a   : > { %909 = vmax.xlane.f32.xlu0 %v908_v45  ;;  %v4170_v46 = vpop.f32.mrf.mxu1 }
 0x367   : > { %1003 = vrot.lane.b32.xlu1 %v4727_v37, %s4519_s18 }
 0x36b   : > { %1081 = vrot.lane.b32.xlu1 %v4730_v38, %s4520_s4 }
 0x36f   : > { %1159 = vrot.lane.b32.xlu1 %v4727_v37, %s4520_s4  ;;  %s4534_s4 = smov 44  }
 0x3df   : > { %v907_v47 = vpop.xlane.xlu1 %906 }
 0x3e0   : > { %v911_v48 = vsub.f32 %v823_v41, %v907_v47 }
 0x3e2   : > { %v913_v49 = vmul.f32 1.442695, %v911_v48 }
 0x3e3   : > { %v1004_v50 = vpop.permute.xlu1 %1003  ;;  %v910_v51 = vpop.xlane.xlu0 %909 }
 0x3e4   : > { %4422 = vpow2.f32 %v913_v49  ;;  %v912_v52 = vsub.f32 %v900_v44, %v910_v51  ;;  %4177 = vmatpush3.msra.mxu1 %v1004_v50 }
 0x3e5   : > { %4186 = vmatprep.subr.mxu1 %v4516_v36 }
 0x3e6   : > { %v915_v53 = vmul.f32 1.442695, %v912_v52 }
 0x3e7   : > { %v1082_v58 = vpop.permute.xlu1 %1081 }
 0x3e8   : > { %4424 = vpow2.f32 %v915_v53 }
 0x3eb   : > { %v1160_v59 = vpop.permute.xlu1 %1159 }
 0x3f1   : > { %v4423_v54 = vpop.eup %4422 }
 0x3f2   : > { %v917_v55 = vsel %vm904_vm4, %v4423_v54, 0.0 }
 0x3f3   : > { %918 = vadd.xlane.f32.xlu0 %v917_v55 }
 0x3f5   : > { %v4425_v56 = vpop.eup %4424 }
 0x3f6   : > { %v920_v57 = vsel %vm904_vm4, %v4425_v56, 0.0 }
 0x3f7   : > { %921 = vadd.xlane.f32.xlu1 %v920_v57 }
 0x408   : > { %1157 = vrot.lane.b32.xlu1 %v4727_v37, %s4521_s19 }
 0x409   : > { %927 = vrot.lane.b32.xlu0 %v4730_v38, %s4519_s18  ;;  %s4533_s18 = smov 108  }
 0x40d   : > { %1079 = vrot.lane.b32.xlu0 %v4730_v38, %s4521_s19  ;;  %s4535_s19 = smov 72  }
 0x47c   : > { %v919_v60 = vpop.xlane.xlu0 %918 }
 0x47d   : > { %4426 = vrcp.f32 %v919_v60 }
 0x480   : > { %v922_v61 = vpop.xlane.xlu1 %921  ;;  %v928_v62 = vpop.permute.xlu0 %927 }
 0x481   : > { %4428 = vrcp.f32 %v922_v61  ;;  %4172 = vmatpush3.msra.mxu0 %v928_v62 }
 0x482   : > { %4181 = vmatprep.subr.mxu0 %v4516_v36 }
 0x484   : > { %v1080_v3 = vpop.permute.xlu0 %1079  ;;  %v1158_v4 = vpop.permute.xlu1 %1157 }
 0x48a   : > { %v4427_v63 = vpop.eup %4426 }
 0x48b   : > { %v925_v0 = vmul.f32 %v4427_v63, %v4423_v54 }
 0x48d   : > { %4174 = vmatmul.mubr.msk.f32.vlgmr.msra.gmra.mxu0 %vm904_vm4, %v925_v0 }
 0x48e   : > { %v4429_v1 = vpop.eup %4428  ;;  %4182 = vmatpush3.xpose.msk.msra.mxu0 %vm752_vm3, %v1082_v58  ;;  %4183 = vmatprep.mubr.msk.f32.mxu0 %vm4517_vm2, %v4516_v36 }
 0x48f   : > { %v926_v2 = vmul.f32 %v4429_v1, %v4425_v56  ;;  %4191 = vmatprep.subr.mxu0 %v4516_v36 }
 0x491   : > { %4179 = vmatmul.mubr.msk.f32.vlgmr.msra.gmra.mxu1 %vm904_vm4, %v926_v2  ;;  %4184 = vmatmul.mubr.msk.f32.vlgmr.msra.gmra.mxu0 %vm752_vm3, %v1080_v3 }
 0x492   : > { %4187 = vmatpush3.xpose.msk.msra.mxu1 %vm752_vm3, %v1160_v59  ;;  %4188 = vmatprep.mubr.msk.f32.mxu1 %vm4517_vm2, %v4516_v36 }
 0x493   : > { %4196 = vmatprep.subr.mxu1 %v4516_v36  ;;  %4193 = vmatprep.mubr.msk.f32.mxu0 %vm4517_vm2, %v4516_v36 }
 0x495   : > { %4189 = vmatmul.mubr.msk.f32.vlgmr.msra.gmra.mxu1 %vm752_vm3, %v1158_v4 }
 0x496   : > { %4198 = vmatprep.mubr.msk.f32.mxu1 %vm4517_vm2, %v4516_v36 }
 0x54d   : > { %v4773_v5 = vpop.f32.mrf.mxu0 }
 0x54f   : > { %v4175_v6 = vpop.f32.mrf.mxu0 }
 0x551   : > { %v4775_v7 = vpop.f32.mrf.mxu1  ;;  %v1153_v8 = vpop.f32.mrf.mxu0 }
 0x552   : > { %v1235_v9 = vsel %vm904_vm4, %v1153_v8, -inf }
 0x553   : > { %1236 = vmax.xlane.f32.xlu0 %v1235_v9  ;;  %v4180_v10 = vpop.f32.mrf.mxu1  ;;  %v4185_v11 = vpop.f32.mrf.mxu0 }
 0x555   : > { %v1231_v12 = vpop.f32.mrf.mxu1 }
 0x556   : > { %v1238_v13 = vsel %vm904_vm4, %v1231_v12, -inf }
 0x557   : > { %1239 = vmax.xlane.f32.xlu1 %v1238_v13  ;;  %v4190_v14 = vpop.f32.mrf.mxu1 }
 0x568   : > { %1333 = vrot.lane.b32.xlu1 %v4727_v37, %s4522_s21 }
 0x569   : > { %1257 = vrot.lane.b32.xlu0 %v4730_v38, %s4522_s21  ;;  %s4536_s21 = smov 104  }
 0x56c   : > { %1411 = vrot.lane.b32.xlu1 %v4730_v38, %s4523_s26 }
 0x570   : > { %1489 = vrot.lane.b32.xlu1 %v4727_v37, %s4523_s26  ;;  %s4537_s26 = smov 40  }
 0x574   : > { %1487 = vrot.lane.b32.xlu1 %v4727_v37, %s4524_s27 }
 0x5dc   : > { %v1237_v15 = vpop.xlane.xlu0 %1236 }
 0x5dd   : > { %v1241_v16 = vsub.f32 %v1153_v8, %v1237_v15 }
 0x5df   : > { %v1243_v17 = vmul.f32 1.442695, %v1241_v16 }
 0x5e0   : > { %v1258_v18 = vpop.permute.xlu0 %1257  ;;  %v1240_v19 = vpop.xlane.xlu1 %1239 }
 0x5e1   : > { %4430 = vpow2.f32 %v1243_v17  ;;  %v1242_v20 = vsub.f32 %v1231_v12, %v1240_v19  ;;  %4192 = vmatpush3.msra.mxu0 %v1258_v18 }
 0x5e2   : > { %4201 = vmatprep.subr.mxu0 %v4516_v36 }
 0x5e3   : > { %v1245_v21 = vmul.f32 1.442695, %v1242_v20 }
 0x5e4   : > { %v1334_v22 = vpop.permute.xlu1 %1333 }
 0x5e5   : > { %4432 = vpow2.f32 %v1245_v21  ;;  %4197 = vmatpush3.msra.mxu1 %v1334_v22 }
 0x5e6   : > { %4206 = vmatprep.subr.mxu1 %v4516_v36 }
 0x5e8   : > { %v1412_v29 = vpop.permute.xlu1 %1411 }
 0x5ec   : > { %v1490_v33 = vpop.permute.xlu1 %1489 }
 0x5ee   : > { %v4431_v23 = vpop.eup %4430 }
 0x5ef   : > { %v1247_v24 = vsel %vm904_vm4, %v4431_v23, 0.0 }
 0x5f0   : > { %1248 = vadd.xlane.f32.xlu0 %v1247_v24  ;;  %v1488_v39 = vpop.permute.xlu1 %1487 }
 0x5f2   : > { %v4433_v25 = vpop.eup %4432 }
 0x5f3   : > { %v1250_v26 = vsel %vm904_vm4, %v4433_v25, 0.0 }
 0x5f4   : > { %1251 = vadd.xlane.f32.xlu0 %v1250_v26 }
 0x60a   : > { %1409 = vrot.lane.b32.xlu0 %v4730_v38, %s4524_s27  ;;  %s4538_s27 = smov 68  }
 0x679   : > { %v1249_v27 = vpop.xlane.xlu0 %1248 }
 0x67a   : > { %4434 = vrcp.f32 %v1249_v27 }
 0x67d   : > { %v1252_v28 = vpop.xlane.xlu0 %1251 }
 0x67e   : > { %4436 = vrcp.f32 %v1252_v28 }
 0x681   : > { %v1410_v35 = vpop.permute.xlu0 %1409 }
 0x687   : > { %v4435_v30 = vpop.eup %4434 }
 0x688   : > { %v1255_v31 = vmul.f32 %v4435_v30, %v4431_v23 }
 0x68a   : > { %4194 = vmatmul.mubr.msk.f32.vlgmr.msra.gmra.mxu0 %vm904_vm4, %v1255_v31 }
 0x68b   : > { %v4437_v32 = vpop.eup %4436  ;;  %4202 = vmatpush3.xpose.msk.msra.mxu0 %vm752_vm3, %v1412_v29  ;;  %4203 = vmatprep.mubr.msk.f32.mxu0 %vm4517_vm2, %v4516_v36 }
 0x68c   : > { %v1256_v34 = vmul.f32 %v4437_v32, %v4433_v25  ;;  %4211 = vmatprep.subr.mxu0 %v4516_v36 }
 0x68e   : > { %4199 = vmatmul.mubr.msk.f32.vlgmr.msra.gmra.mxu1 %vm904_vm4, %v1256_v34  ;;  %4204 = vmatmul.mubr.msk.f32.vlgmr.msra.gmra.mxu0 %vm752_vm3, %v1410_v35 }
 0x68f   : > { %4207 = vmatpush3.xpose.msk.msra.mxu1 %vm752_vm3, %v1490_v33  ;;  %4208 = vmatprep.mubr.msk.f32.mxu1 %vm4517_vm2, %v4516_v36 }
 0x690   : > { %4216 = vmatprep.subr.mxu1 %v4516_v36  ;;  %4213 = vmatprep.mubr.msk.f32.mxu0 %vm4517_vm2, %v4516_v36 }
 0x692   : > { %4209 = vmatmul.mubr.msk.f32.vlgmr.msra.gmra.mxu1 %vm752_vm3, %v1488_v39 }
 0x693   : > { %4218 = vmatprep.mubr.msk.f32.mxu1 %vm4517_vm2, %v4516_v36 }
 0x74a   : > { %v4805_v40 = vpop.f32.mrf.mxu0 }
 0x74c   : > { %v4195_v41 = vpop.f32.mrf.mxu0 }
 0x74e   : > { %v4807_v42 = vpop.f32.mrf.mxu1  ;;  %v1483_v43 = vpop.f32.mrf.mxu0 }
 0x74f   : > { %v1565_v44 = vsel %vm904_vm4, %v1483_v43, -inf }
 0x750   : > { %1566 = vmax.xlane.f32.xlu0 %v1565_v44  ;;  %v4200_v45 = vpop.f32.mrf.mxu1  ;;  %v4205_v46 = vpop.f32.mrf.mxu0 }
 0x752   : > { %v1561_v47 = vpop.f32.mrf.mxu1 }
 0x753   : > { %v1568_v48 = vsel %vm904_vm4, %v1561_v47, -inf }
 0x754   : > { %1569 = vmax.xlane.f32.xlu1 %v1568_v48  ;;  %v4210_v49 = vpop.f32.mrf.mxu1 }
 0x765   : > { %1663 = vrot.lane.b32.xlu1 %v4727_v37, %s4525_s22 }
 0x766   : > { %1587 = vrot.lane.b32.xlu0 %v4730_v38, %s4525_s22  ;;  %s4539_s22 = smov 100  }
 0x769   : > { %1741 = vrot.lane.b32.xlu1 %v4730_v38, %s4526_s28 }
 0x76d   : > { %1819 = vrot.lane.b32.xlu1 %v4727_v37, %s4526_s28  ;;  %s4540_s28 = smov 36  }
 0x771   : > { %1817 = vrot.lane.b32.xlu1 %v4727_v37, %s4527_s13 }
 0x7d9   : > { %v1567_v50 = vpop.xlane.xlu0 %1566 }
 0x7da   : > { %v1571_v51 = vsub.f32 %v1483_v43, %v1567_v50 }
 0x7dc   : > { %v1573_v52 = vmul.f32 1.442695, %v1571_v51 }
 0x7dd   : > { %v1588_v53 = vpop.permute.xlu0 %1587  ;;  %v1570_v54 = vpop.xlane.xlu1 %1569 }
 0x7de   : > { %4438 = vpow2.f32 %v1573_v52  ;;  %v1572_v55 = vsub.f32 %v1561_v47, %v1570_v54  ;;  %4212 = vmatpush3.msra.mxu0 %v1588_v53 }
 0x7df   : > { %4221 = vmatprep.subr.mxu0 %v4516_v36 }
 0x7e0   : > { %v1575_v56 = vmul.f32 1.442695, %v1572_v55 }
 0x7e1   : > { %v1664_v57 = vpop.permute.xlu1 %1663 }
 0x7e2   : > { %4440 = vpow2.f32 %v1575_v56  ;;  %4217 = vmatpush3.msra.mxu1 %v1664_v57 }
 0x7e3   : > { %4226 = vmatprep.subr.mxu1 %v4516_v36 }
 0x7e5   : > { %v1742_v0 = vpop.permute.xlu1 %1741 }
 0x7e9   : > { %v1820_v4 = vpop.permute.xlu1 %1819 }
 0x7eb   : > { %v4439_v58 = vpop.eup %4438 }
 0x7ec   : > { %v1577_v59 = vsel %vm904_vm4, %v4439_v58, 0.0 }
 0x7ed   : > { %1578 = vadd.xlane.f32.xlu0 %v1577_v59  ;;  %v1818_v9 = vpop.permute.xlu1 %1817 }
 0x7ef   : > { %v4441_v60 = vpop.eup %4440 }
 0x7f0   : > { %v1580_v61 = vsel %vm904_vm4, %v4441_v60, 0.0 }
 0x7f1   : > { %1581 = vadd.xlane.f32.xlu0 %v1580_v61 }
 0x807   : > { %1739 = vrot.lane.b32.xlu0 %v4730_v38, %s4527_s13  ;;  %s4541_s13 = smov 4  }
 0x876   : > { %v1579_v62 = vpop.xlane.xlu0 %1578 }
 0x877   : > { %4442 = vrcp.f32 %v1579_v62 }
 0x87a   : > { %v1582_v63 = vpop.xlane.xlu0 %1581 }
 0x87b   : > { %4444 = vrcp.f32 %v1582_v63 }
 0x87e   : > { %v1740_v8 = vpop.permute.xlu0 %1739 }
 0x884   : > { %v4443_v1 = vpop.eup %4442 }
 0x885   : > { %v1585_v2 = vmul.f32 %v4443_v1, %v4439_v58 }
 0x887   : > { %4214 = vmatmul.mubr.msk.f32.vlgmr.msra.gmra.mxu0 %vm904_vm4, %v1585_v2 }
 0x888   : > { %v4445_v3 = vpop.eup %4444  ;;  %4222 = vmatpush3.xpose.msk.msra.mxu0 %vm752_vm3, %v1742_v0  ;;  %4223 = vmatprep.mubr.msk.f32.mxu0 %vm4517_vm2, %v4516_v36 }
 0x889   : > { %v1586_v6 = vmul.f32 %v4445_v3, %v4441_v60  ;;  %4231 = vmatprep.subr.mxu0 %v4516_v36 }
 0x88b   : > { %4219 = vmatmul.mubr.msk.f32.vlgmr.msra.gmra.mxu1 %vm904_vm4, %v1586_v6  ;;  %4224 = vmatmul.mubr.msk.f32.vlgmr.msra.gmra.mxu0 %vm752_vm3, %v1740_v8 }
 0x88c   : > { %4227 = vmatpush3.xpose.msk.msra.mxu1 %vm752_vm3, %v1820_v4  ;;  %4228 = vmatprep.mubr.msk.f32.mxu1 %vm4517_vm2, %v4516_v36 }
 0x88d   : > { %4236 = vmatprep.subr.mxu1 %v4516_v36  ;;  %4233 = vmatprep.mubr.msk.f32.mxu0 %vm4517_vm2, %v4516_v36 }
 0x88f   : > { %4229 = vmatmul.mubr.msk.f32.vlgmr.msra.gmra.mxu1 %vm752_vm3, %v1818_v9 }
 0x890   : > { %4238 = vmatprep.mubr.msk.f32.mxu1 %vm4517_vm2, %v4516_v36 }
 0x947   : > { %v4837_v10 = vpop.f32.mrf.mxu0 }
 0x949   : > { %v4215_v11 = vpop.f32.mrf.mxu0 }
 0x94b   : > { %v4839_v12 = vpop.f32.mrf.mxu1  ;;  %v1813_v13 = vpop.f32.mrf.mxu0 }
 0x94c   : > { %v1895_v14 = vsel %vm904_vm4, %v1813_v13, -inf }
 0x94d   : > { %1896 = vmax.xlane.f32.xlu0 %v1895_v14  ;;  %v4220_v15 = vpop.f32.mrf.mxu1  ;;  %v4225_v16 = vpop.f32.mrf.mxu0 }
 0x94f   : > { %v1891_v17 = vpop.f32.mrf.mxu1 }
 0x950   : > { %v1898_v18 = vsel %vm904_vm4, %v1891_v17, -inf }
 0x951   : > { %1899 = vmax.xlane.f32.xlu1 %v1898_v18  ;;  %v4230_v19 = vpop.f32.mrf.mxu1 }
 0x962   : > { %1993 = vrot.lane.b32.xlu1 %v4727_v37, %s4528_s30 }
 0x963   : > { %1917 = vrot.lane.b32.xlu0 %v4730_v38, %s4528_s30  ;;  %s4542_s30 = smov 8  }
 0x966   : > { %2071 = vrot.lane.b32.xlu1 %v4730_v38, %s4529_s14 }
 0x96a   : > { %2149 = vrot.lane.b32.xlu1 %v4727_v37, %s4529_s14  ;;  %s4543_s14 = smov 12  }
 0x96e   : > { %2147 = vrot.lane.b32.xlu1 %v4727_v37, %s4530_s15 }
 0x9d6   : > { %v1897_v20 = vpop.xlane.xlu0 %1896 }
 0x9d7   : > { %v1901_v21 = vsub.f32 %v1813_v13, %v1897_v20 }
 0x9d9   : > { %v1903_v22 = vmul.f32 1.442695, %v1901_v21 }
 0x9da   : > { %v1918_v23 = vpop.permute.xlu0 %1917  ;;  %v1900_v24 = vpop.xlane.xlu1 %1899 }
 0x9db   : > { %4446 = vpow2.f32 %v1903_v22  ;;  %v1902_v25 = vsub.f32 %v1891_v17, %v1900_v24  ;;  %4232 = vmatpush3.msra.mxu0 %v1918_v23 }
 0x9dc   : > { %4241 = vmatprep.subr.mxu0 %v4516_v36 }
 0x9dd   : > { %v1905_v26 = vmul.f32 1.442695, %v1902_v25 }
 0x9de   : > { %v1994_v27 = vpop.permute.xlu1 %1993 }
 0x9df   : > { %4448 = vpow2.f32 %v1905_v26  ;;  %4237 = vmatpush3.msra.mxu1 %v1994_v27 }
 0x9e0   : > { %4246 = vmatprep.subr.mxu1 %v4516_v36 }
 0x9e2   : > { %v2072_v34 = vpop.permute.xlu1 %2071 }
 0x9e6   : > { %v2150_v43 = vpop.permute.xlu1 %2149 }
 0x9e8   : > { %v4447_v28 = vpop.eup %4446 }
 0x9e9   : > { %v1907_v29 = vsel %vm904_vm4, %v4447_v28, 0.0 }
 0x9ea   : > { %1908 = vadd.xlane.f32.xlu0 %v1907_v29  ;;  %v2148_v46 = vpop.permute.xlu1 %2147 }
 0x9ec   : > { %v4449_v30 = vpop.eup %4448 }
 0x9ed   : > { %v1910_v31 = vsel %vm904_vm4, %v4449_v30, 0.0 }
 0x9ee   : > { %1911 = vadd.xlane.f32.xlu0 %v1910_v31 }
 0xa04   : > { %2069 = vrot.lane.b32.xlu0 %v4730_v38, %s4530_s15  ;;  %s4544_s15 = smov 16  }
 0xa73   : > { %v1909_v32 = vpop.xlane.xlu0 %1908 }
 0xa74   : > { %4450 = vrcp.f32 %v1909_v32 }
 0xa77   : > { %v1912_v33 = vpop.xlane.xlu0 %1911 }
 0xa78   : > { %4452 = vrcp.f32 %v1912_v33 }
 0xa7b   : > { %v2070_v45 = vpop.permute.xlu0 %2069 }
 0xa81   : > { %v4451_v35 = vpop.eup %4450 }
 0xa82   : > { %v1915_v39 = vmul.f32 %v4451_v35, %v4447_v28 }
 0xa84   : > { %4234 = vmatmul.mubr.msk.f32.vlgmr.msra.gmra.mxu0 %vm904_vm4, %v1915_v39 }
 0xa85   : > { %v4453_v41 = vpop.eup %4452  ;;  %4242 = vmatpush3.xpose.msk.msra.mxu0 %vm752_vm3, %v2072_v34  ;;  %4243 = vmatprep.mubr.msk.f32.mxu0 %vm4517_vm2, %v4516_v36 }
 0xa86   : > { %v1916_v44 = vmul.f32 %v4453_v41, %v4449_v30  ;;  %4251 = vmatprep.subr.mxu0 %v4516_v36 }
 0xa88   : > { %4239 = vmatmul.mubr.msk.f32.vlgmr.msra.gmra.mxu1 %vm904_vm4, %v1916_v44  ;;  %4244 = vmatmul.mubr.msk.f32.vlgmr.msra.gmra.mxu0 %vm752_vm3, %v2070_v45 }
 0xa89   : > { %4247 = vmatpush3.xpose.msk.msra.mxu1 %vm752_vm3, %v2150_v43  ;;  %4248 = vmatprep.mubr.msk.f32.mxu1 %vm4517_vm2, %v4516_v36 }
 0xa8a   : > { %4256 = vmatprep.subr.mxu1 %v4516_v36  ;;  %4253 = vmatprep.mubr.msk.f32.mxu0 %vm4517_vm2, %v4516_v36 }
 0xa8c   : > { %4249 = vmatmul.mubr.msk.f32.vlgmr.msra.gmra.mxu1 %vm752_vm3, %v2148_v46 }
 0xa8d   : > { %4258 = vmatprep.mubr.msk.f32.mxu1 %vm4517_vm2, %v4516_v36 }
 0xb44   : > { %v4869_v47 = vpop.f32.mrf.mxu0 }
 0xb46   : > { %v4235_v48 = vpop.f32.mrf.mxu0 }
 0xb48   : > { %v4871_v49 = vpop.f32.mrf.mxu1  ;;  %v2143_v50 = vpop.f32.mrf.mxu0 }
 0xb49   : > { %v2225_v51 = vsel %vm904_vm4, %v2143_v50, -inf }
 0xb4a   : > { %2226 = vmax.xlane.f32.xlu0 %v2225_v51  ;;  %v4240_v52 = vpop.f32.mrf.mxu1  ;;  %v4245_v53 = vpop.f32.mrf.mxu0 }
 0xb4c   : > { %v2221_v54 = vpop.f32.mrf.mxu1 }
 0xb4d   : > { %v2228_v55 = vsel %vm904_vm4, %v2221_v54, -inf }
 0xb4e   : > { %2229 = vmax.xlane.f32.xlu1 %v2228_v55  ;;  %v4250_v56 = vpop.f32.mrf.mxu1 }
 0xb5f   : > { %2323 = vrot.lane.b32.xlu1 %v4727_v37, %s4531_s20 }
 0xb60   : > { %2247 = vrot.lane.b32.xlu0 %v4730_v38, %s4531_s20  ;;  %s4545_s20 = smov 20  }
 0xb63   : > { %2401 = vrot.lane.b32.xlu1 %v4730_v38, %s4532_s16 }
 0xb67   : > { %2479 = vrot.lane.b32.xlu1 %v4727_v37, %s4532_s16  ;;  %s4546_s16 = smov 24  }
 0xb6b   : > { %2477 = vrot.lane.b32.xlu1 %v4727_v37, %s4533_s18 }
 0xbd3   : > { %v2227_v57 = vpop.xlane.xlu0 %2226 }
 0xbd4   : > { %v2231_v58 = vsub.f32 %v2143_v50, %v2227_v57 }
 0xbd6   : > { %v2233_v59 = vmul.f32 1.442695, %v2231_v58 }
 0xbd7   : > { %v2248_v60 = vpop.permute.xlu0 %2247  ;;  %v2230_v61 = vpop.xlane.xlu1 %2229 }
 0xbd8   : > { %4454 = vpow2.f32 %v2233_v59  ;;  %v2232_v62 = vsub.f32 %v2221_v54, %v2230_v61  ;;  %4252 = vmatpush3.msra.mxu0 %v2248_v60 }
 0xbd9   : > { %4261 = vmatprep.subr.mxu0 %v4516_v36 }
 0xbda   : > { %v2235_v63 = vmul.f32 1.442695, %v2232_v62 }
 0xbdb   : > { %v2324_v0 = vpop.permute.xlu1 %2323 }
 0xbdc   : > { %4456 = vpow2.f32 %v2235_v63  ;;  %4257 = vmatpush3.msra.mxu1 %v2324_v0 }
 0xbdd   : > { %4266 = vmatprep.subr.mxu1 %v4516_v36 }
 0xbdf   : > { %v2402_v9 = vpop.permute.xlu1 %2401 }
 0xbe3   : > { %v2480_v15 = vpop.permute.xlu1 %2479 }
 0xbe5   : > { %v4455_v1 = vpop.eup %4454 }
 0xbe6   : > { %v2237_v2 = vsel %vm904_vm4, %v4455_v1, 0.0 }
 0xbe7   : > { %2238 = vadd.xlane.f32.xlu0 %v2237_v2  ;;  %v2478_v18 = vpop.permute.xlu1 %2477 }
 0xbe9   : > { %v4457_v3 = vpop.eup %4456 }
 0xbea   : > { %v2240_v4 = vsel %vm904_vm4, %v4457_v3, 0.0 }
 0xbeb   : > { %2241 = vadd.xlane.f32.xlu0 %v2240_v4 }
 0xc01   : > { %2399 = vrot.lane.b32.xlu0 %v4730_v38, %s4533_s18  ;;  %s4547_s18 = smov 28  }
 0xc70   : > { %v2239_v6 = vpop.xlane.xlu0 %2238 }
 0xc71   : > { %4458 = vrcp.f32 %v2239_v6 }
 0xc74   : > { %v2242_v8 = vpop.xlane.xlu0 %2241 }
 0xc75   : > { %4460 = vrcp.f32 %v2242_v8 }
 0xc78   : > { %v2400_v17 = vpop.permute.xlu0 %2399 }
 0xc7e   : > { %v4459_v11 = vpop.eup %4458 }
 0xc7f   : > { %v2245_v13 = vmul.f32 %v4459_v11, %v4455_v1 }
 0xc81   : > { %4254 = vmatmul.mubr.msk.f32.vlgmr.msra.gmra.mxu0 %vm904_vm4, %v2245_v13 }
 0xc82   : > { %v4461_v14 = vpop.eup %4460  ;;  %4262 = vmatpush3.xpose.msk.msra.mxu0 %vm752_vm3, %v2402_v9  ;;  %4263 = vmatprep.mubr.msk.f32.mxu0 %vm4517_vm2, %v4516_v36 }
 0xc83   : > { %v2246_v16 = vmul.f32 %v4461_v14, %v4457_v3  ;;  %4271 = vmatprep.subr.mxu0 %v4516_v36 }
 0xc85   : > { %4259 = vmatmul.mubr.msk.f32.vlgmr.msra.gmra.mxu1 %vm904_vm4, %v2246_v16  ;;  %4264 = vmatmul.mubr.msk.f32.vlgmr.msra.gmra.mxu0 %vm752_vm3, %v2400_v17 }
 0xc86   : > { %4267 = vmatpush3.xpose.msk.msra.mxu1 %vm752_vm3, %v2480_v15  ;;  %4268 = vmatprep.mubr.msk.f32.mxu1 %vm4517_vm2, %v4516_v36 }
 0xc87   : > { %4276 = vmatprep.subr.mxu1 %v4516_v36  ;;  %4273 = vmatprep.mubr.msk.f32.mxu0 %vm4517_vm2, %v4516_v36 }
 0xc89   : > { %4269 = vmatmul.mubr.msk.f32.vlgmr.msra.gmra.mxu1 %vm752_vm3, %v2478_v18 }
 0xc8a   : > { %4278 = vmatprep.mubr.msk.f32.mxu1 %vm4517_vm2, %v4516_v36 }
 0xd41   : > { %v4901_v19 = vpop.f32.mrf.mxu0 }
 0xd43   : > { %v4255_v20 = vpop.f32.mrf.mxu0 }
 0xd45   : > { %v4903_v21 = vpop.f32.mrf.mxu1  ;;  %v2473_v22 = vpop.f32.mrf.mxu0 }
 0xd46   : > { %v2555_v23 = vsel %vm904_vm4, %v2473_v22, -inf }
 0xd47   : > { %2556 = vmax.xlane.f32.xlu0 %v2555_v23  ;;  %v4260_v24 = vpop.f32.mrf.mxu1  ;;  %v4265_v25 = vpop.f32.mrf.mxu0 }
 0xd49   : > { %v2551_v26 = vpop.f32.mrf.mxu1 }
 0xd4a   : > { %v2558_v27 = vsel %vm904_vm4, %v2551_v26, -inf }
 0xd4b   : > { %2559 = vmax.xlane.f32.xlu1 %v2558_v27  ;;  %v4270_v28 = vpop.f32.mrf.mxu1 }
 0xd5c   : > { %2653 = vrot.lane.b32.xlu1 %v4727_v37, %s4534_s4 }
 0xd5d   : > { %2577 = vrot.lane.b32.xlu0 %v4730_v38, %s4534_s4 }
 0xd60   : > { %2731 = vrot.lane.b32.xlu1 %v4730_v38, %s4535_s19 }
 0xd64   : > { %2809 = vrot.lane.b32.xlu1 %v4727_v37, %s4535_s19  ;;  %s5099_s19 = sld [smem:[#allocation7_spill]] }
 0xd68   : > { %2807 = vrot.lane.b32.xlu1 %v4727_v37, %s4536_s21 }
 0xdd0   : > { %v2557_v29 = vpop.xlane.xlu0 %2556 }
 0xdd1   : > { %v2561_v30 = vsub.f32 %v2473_v22, %v2557_v29 }
 0xdd3   : > { %v2563_v31 = vmul.f32 1.442695, %v2561_v30 }
 0xdd4   : > { %v2578_v32 = vpop.permute.xlu0 %2577  ;;  %v2560_v33 = vpop.xlane.xlu1 %2559 }
 0xdd5   : > { %4462 = vpow2.f32 %v2563_v31  ;;  %v2562_v34 = vsub.f32 %v2551_v26, %v2560_v33  ;;  %4272 = vmatpush3.msra.mxu0 %v2578_v32 }
 0xdd6   : > { %4281 = vmatprep.subr.mxu0 %v4516_v36 }
 0xdd7   : > { %v2565_v35 = vmul.f32 1.442695, %v2562_v34 }
 0xdd8   : > { %v2654_v39 = vpop.permute.xlu1 %2653 }
 0xdd9   : > { %4464 = vpow2.f32 %v2565_v35  ;;  %4277 = vmatpush3.msra.mxu1 %v2654_v39 }
 0xdda   : > { %4286 = vmatprep.subr.mxu1 %v4516_v36 }
 0xddc   : > { %v2732_v50 = vpop.permute.xlu1 %2731 }
 0xde0   : > { %v2810_v54 = vpop.permute.xlu1 %2809 }
 0xde2   : > { %v4463_v41 = vpop.eup %4462 }
 0xde3   : > { %v2567_v43 = vsel %vm904_vm4, %v4463_v41, 0.0 }
 0xde4   : > { %2568 = vadd.xlane.f32.xlu0 %v2567_v43  ;;  %v2808_v57 = vpop.permute.xlu1 %2807 }
 0xde6   : > { %v4465_v44 = vpop.eup %4464 }
 0xde7   : > { %v2570_v45 = vsel %vm904_vm4, %v4465_v44, 0.0 }
 0xde8   : > { %2571 = vadd.xlane.f32.xlu0 %v2570_v45 }
 0xdfe   : > { %2729 = vrot.lane.b32.xlu0 %v4730_v38, %s4536_s21  ;;  %s5100_s21 = scalar_lea.vmem %s5099_s19, %s4631_s25 }
 0xe6d   : > { %v2569_v46 = vpop.xlane.xlu0 %2568 }
 0xe6e   : > { %4466 = vrcp.f32 %v2569_v46 }
 0xe71   : > { %v2572_v48 = vpop.xlane.xlu0 %2571 }
 0xe72   : > { %4468 = vrcp.f32 %v2572_v48 }
 0xe75   : > { %v2730_v56 = vpop.permute.xlu0 %2729 }
 0xe7b   : > { %v4467_v51 = vpop.eup %4466 }
 0xe7c   : > { %v2575_v52 = vmul.f32 %v4467_v51, %v4463_v41 }
 0xe7e   : > { %4274 = vmatmul.mubr.msk.f32.vlgmr.msra.gmra.mxu0 %vm904_vm4, %v2575_v52 }
 0xe7f   : > { %v4469_v53 = vpop.eup %4468  ;;  %4282 = vmatpush3.xpose.msk.msra.mxu0 %vm752_vm3, %v2732_v50  ;;  %4283 = vmatprep.mubr.msk.f32.mxu0 %vm4517_vm2, %v4516_v36 }
 0xe80   : > { %v2576_v55 = vmul.f32 %v4469_v53, %v4465_v44  ;;  %4291 = vmatprep.subr.mxu0 %v4516_v36 }
 0xe82   : > { %4279 = vmatmul.mubr.msk.f32.vlgmr.msra.gmra.mxu1 %vm904_vm4, %v2576_v55  ;;  %4284 = vmatmul.mubr.msk.f32.vlgmr.msra.gmra.mxu0 %vm752_vm3, %v2730_v56 }
 0xe83   : > { %4287 = vmatpush3.xpose.msk.msra.mxu1 %vm752_vm3, %v2810_v54  ;;  %4288 = vmatprep.mubr.msk.f32.mxu1 %vm4517_vm2, %v4516_v36 }
 0xe84   : > { %4296 = vmatprep.subr.mxu1 %v4516_v36  ;;  %4293 = vmatprep.mubr.msk.f32.mxu0 %vm4517_vm2, %v4516_v36 }
 0xe86   : > { %4289 = vmatmul.mubr.msk.f32.vlgmr.msra.gmra.mxu1 %vm752_vm3, %v2808_v57  ;;  %v3466_v57 = vld [vmem:[%s4654_s24 + $0x10] sm:$0xff] }
 0xe87   : > { %4298 = vmatprep.mubr.msk.f32.mxu1 %vm4517_vm2, %v4516_v36 }
 0xf3e   : > { %v4933_v58 = vpop.f32.mrf.mxu0 }
 0xf40   : > { %v4275_v59 = vpop.f32.mrf.mxu0 }
 0xf41   : > { %v3464_v59 = vld [vmem:[%s4654_s24] sm:$0xff] }
 0xf42   : > { %v4935_v60 = vpop.f32.mrf.mxu1  ;;  %v2803_v61 = vpop.f32.mrf.mxu0 }
 0xf43   : > { %v2885_v62 = vsel %vm904_vm4, %v2803_v61, -inf }
 0xf44   : > { %2886 = vmax.xlane.f32.xlu0 %v2885_v62  ;;  %v4280_v63 = vpop.f32.mrf.mxu1  ;;  %v4285_v0 = vpop.f32.mrf.mxu0 }
 0xf46   : > { %v2881_v1 = vpop.f32.mrf.mxu1 }
 0xf47   : > { %v2888_v2 = vsel %vm904_vm4, %v2881_v1, -inf }
 0xf48   : > { %2889 = vmax.xlane.f32.xlu1 %v2888_v2  ;;  %v4290_v3 = vpop.f32.mrf.mxu1 }
 0xf59   : > { %2983 = vrot.lane.b32.xlu1 %v4727_v37, %s4537_s26 }
 0xf5a   : > { %2907 = vrot.lane.b32.xlu0 %v4730_v38, %s4537_s26 }
 0xf5d   : > { %3061 = vrot.lane.b32.xlu1 %v4730_v38, %s4538_s27 }
 0xf61   : > { %3139 = vrot.lane.b32.xlu1 %v4727_v37, %s4538_s27 }
 0xf65   : > { %3137 = vrot.lane.b32.xlu1 %v4727_v37, %s4539_s22 }
 0xfcd   : > { %v2887_v4 = vpop.xlane.xlu0 %2886 }
 0xfce   : > { %v2891_v6 = vsub.f32 %v2803_v61, %v2887_v4 }
 0xfd0   : > { %v2893_v8 = vmul.f32 1.442695, %v2891_v6 }
 0xfd1   : > { %v2908_v9 = vpop.permute.xlu0 %2907  ;;  %v2890_v11 = vpop.xlane.xlu1 %2889 }
 0xfd2   : > { %4470 = vpow2.f32 %v2893_v8  ;;  %v2892_v13 = vsub.f32 %v2881_v1, %v2890_v11  ;;  %4292 = vmatpush3.msra.mxu0 %v2908_v9 }
 0xfd3   : > { %4301 = vmatprep.subr.mxu0 %v4516_v36 }
 0xfd4   : > { %v2895_v14 = vmul.f32 1.442695, %v2892_v13 }
 0xfd5   : > { %v2984_v15 = vpop.permute.xlu1 %2983 }
 0xfd6   : > { %4472 = vpow2.f32 %v2895_v14  ;;  %4297 = vmatpush3.msra.mxu1 %v2984_v15 }
 0xfd7   : > { %4306 = vmatprep.subr.mxu1 %v4516_v36 }
 0xfd9   : > { %v3062_v24 = vpop.permute.xlu1 %3061 }
 0xfdd   : > { %v3140_v28 = vpop.permute.xlu1 %3139 }
 0xfdf   : > { %v4471_v16 = vpop.eup %4470 }
 0xfe0   : > { %v2897_v17 = vsel %vm904_vm4, %v4471_v16, 0.0 }
 0xfe1   : > { %2898 = vadd.xlane.f32.xlu0 %v2897_v17  ;;  %v3138_v31 = vpop.permute.xlu1 %3137 }
 0xfe3   : > { %v4473_v18 = vpop.eup %4472 }
 0xfe4   : > { %v2900_v20 = vsel %vm904_vm4, %v4473_v18, 0.0 }
 0xfe5   : > { %2901 = vadd.xlane.f32.xlu0 %v2900_v20 }
 0xffb   : > { %3059 = vrot.lane.b32.xlu0 %v4730_v38, %s4539_s22 }
0x106a   : > { %v2899_v22 = vpop.xlane.xlu0 %2898 }
0x106b   : > { %4474 = vrcp.f32 %v2899_v22 }
0x106e   : > { %v2902_v23 = vpop.xlane.xlu0 %2901 }
0x106f   : > { %4476 = vrcp.f32 %v2902_v23 }
0x1072   : > { %v3060_v30 = vpop.permute.xlu0 %3059 }
0x1078   : > { %v4475_v25 = vpop.eup %4474 }
0x1079   : > { %v2905_v26 = vmul.f32 %v4475_v25, %v4471_v16 }
0x107b   : > { %4294 = vmatmul.mubr.msk.f32.vlgmr.msra.gmra.mxu0 %vm904_vm4, %v2905_v26 }
0x107c   : > { %v4477_v27 = vpop.eup %4476  ;;  %4302 = vmatpush3.xpose.msk.msra.mxu0 %vm752_vm3, %v3062_v24  ;;  %4303 = vmatprep.mubr.msk.f32.mxu0 %vm4517_vm2, %v4516_v36 }
0x107d   : > { %v2906_v29 = vmul.f32 %v4477_v27, %v4473_v18  ;;  %4311 = vmatprep.subr.mxu0 %v4516_v36 }
0x107f   : > { %4299 = vmatmul.mubr.msk.f32.vlgmr.msra.gmra.mxu1 %vm904_vm4, %v2906_v29  ;;  %4304 = vmatmul.mubr.msk.f32.vlgmr.msra.gmra.mxu0 %vm752_vm3, %v3060_v30 }
0x1080   : > { %4307 = vmatpush3.xpose.msk.msra.mxu1 %vm752_vm3, %v3140_v28  ;;  %4308 = vmatprep.mubr.msk.f32.mxu1 %vm4517_vm2, %v4516_v36 }
0x1081   : > { %4316 = vmatprep.subr.mxu1 %v4516_v36  ;;  %4313 = vmatprep.mubr.msk.f32.mxu0 %vm4517_vm2, %v4516_v36 }
0x1083   : > { %4309 = vmatmul.mubr.msk.f32.vlgmr.msra.gmra.mxu1 %vm752_vm3, %v3138_v31 }
0x1084   : > { %4318 = vmatprep.mubr.msk.f32.mxu1 %vm4517_vm2, %v4516_v36 }
0x113b   : > { %v2979_v32 = vpop.f32.mrf.mxu0 }
0x113d   : > { %v4295_v33 = vpop.f32.mrf.mxu0 }
0x113f   : > { %v3055_v34 = vpop.f32.mrf.mxu1  ;;  %v3133_v35 = vpop.f32.mrf.mxu0 }
0x1140   : > { %v3215_v39 = vsel %vm904_vm4, %v3133_v35, -inf }
0x1141   : > { %3216 = vmax.xlane.f32.xlu0 %v3215_v39  ;;  %v4300_v41 = vpop.f32.mrf.mxu1  ;;  %v4305_v43 = vpop.f32.mrf.mxu0  ;;  %v4490_v39 = vld [vmem:[%s5085_s12 + $0x8] sm:$0xff] }
0x1143   : > { %v3211_v44 = vpop.f32.mrf.mxu1 }
0x1144   : > { %v3218_v45 = vsel %vm904_vm4, %v3211_v44, -inf }
0x1145   : > { %3219 = vmax.xlane.f32.xlu1 %v3218_v45  ;;  %v4310_v46 = vpop.f32.mrf.mxu1 }
0x1156   : > { %3313 = vrot.lane.b32.xlu1 %v4727_v37, %s4540_s28 }
0x115a   : > { %3391 = vrot.lane.b32.xlu1 %v4805_v40, %s4541_s13 }
0x115e   : > { %3393 = vrot.lane.b32.xlu1 %v4807_v42, %s4541_s13 }
0x1162   : > { %3401 = vrot.lane.b32.xlu1 %v4839_v12, %s4542_s30 }
0x1166   : > { %3409 = vrot.lane.b32.xlu1 %v4871_v49, %s4543_s14 }
0x116a   : > { %3417 = vrot.lane.b32.xlu1 %v4903_v21, %s4544_s15 }
0x116e   : > { %3425 = vrot.lane.b32.xlu1 %v4935_v60, %s4545_s20 }
0x1172   : > { %3433 = vrot.lane.b32.xlu1 %v3055_v34, %s4546_s16 }
0x11ca   : > { %v3217_v36 = vpop.xlane.xlu0 %3216 }
0x11cb   : > { %v3221_v37 = vsub.f32 %v3133_v35, %v3217_v36 }
0x11cd   : > { %v3223_v48 = vmul.f32 1.442695, %v3221_v37 }
0x11ce   : > { %v3220_v40 = vpop.xlane.xlu1 %3219 }
0x11cf   : > { %4478 = vpow2.f32 %v3223_v48  ;;  %v3222_v42 = vsub.f32 %v3211_v44, %v3220_v40  ;;  %v4491_v44 = vld [vmem:[%s5085_s12] sm:$0xff] }
0x11d1   : > { %v3225_v50 = vmul.f32 1.442695, %v3222_v42 }
0x11d2   : > { %v3314_v51 = vpop.permute.xlu1 %3313 }
0x11d3   : > { %4480 = vpow2.f32 %v3225_v50  ;;  %4317 = vmatpush3.msra.mxu1 %v3314_v51 }
0x11d6   : > { %v3392_v0 = vpop.permute.xlu1 %3391 }
0x11d7   : > { %v3445_v14 = vsel %vm752_vm3, %v4773_v5, %v3392_v0 }
0x11da   : > { %v3394_v1 = vpop.permute.xlu1 %3393 }
0x11db   : > { %v3446_v20 = vsel %vm752_vm3, %v4775_v7, %v3394_v1  ;;  %v4039_v7 = vld [vmem:[%s5100_s21] ss:$0 sm:$0xff] }
0x11dc   : > { %v4479_v12 = vpop.eup %4478 }
0x11dd   : > { %v3227_v49 = vsel %vm904_vm4, %v4479_v12, 0.0 }
0x11de   : > { %3228 = vadd.xlane.f32.xlu0 %v3227_v49  ;;  %v3402_v3 = vpop.permute.xlu1 %3401 }
0x11df   : > { %v3448_v23 = vsel %vm904_vm4, %v3446_v20, %v3402_v3 }
0x11e0   : > { %v4481_v21 = vpop.eup %4480 }
0x11e1   : > { %v3230_v52 = vsel %vm904_vm4, %v4481_v21, 0.0 }
0x11e2   : > { %3231 = vadd.xlane.f32.xlu0 %v3230_v52  ;;  %v3410_v6 = vpop.permute.xlu1 %3409 }
0x11e3   : > { %v3451_v26 = vsel %vm3449_vm5, %v3448_v23, %v3410_v6 }
0x11e6   : > { %v3418_v9 = vpop.permute.xlu1 %3417 }
0x11e7   : > { %v3454_v28 = vsel %vm3452_vm6, %v3451_v26, %v3418_v9 }
0x11ea   : > { %v3426_v13 = vpop.permute.xlu1 %3425 }
0x11eb   : > { %v3457_v29 = vsel %vm3455_vm7, %v3454_v28, %v3426_v13  ;;  %v3699_v13 = vld [vmem:[%s4681_s29 + $0x18] sm:$0xff] }
0x11ee   : > { %v3434_v24 = vpop.permute.xlu1 %3433 }
0x11ef   : > { %v3460_v30 = vsel %vm3458_vm9, %v3457_v29, %v3434_v24 }
0x11f8   : > { %3237 = vrot.lane.b32.xlu0 %v4730_v38, %s4540_s28 }
0x11fc   : > { %3399 = vrot.lane.b32.xlu0 %v4837_v10, %s4542_s30  ;;  %s5101_s30 = scalar_lea.vmem %s5079_s6, %s4631_s25 }
0x11fd   : > { %v4042_v0 = vld [vmem:[%s5101_s30] ss:$0 sm:$0xff] }
0x1200   : > { %3407 = vrot.lane.b32.xlu0 %v4869_v47, %s4543_s14 }
0x1204   : > { %3415 = vrot.lane.b32.xlu0 %v4901_v19, %s4544_s15  ;;  %v3467_v19 = vld [vmem:[%s4654_s24 + $0x18] sm:$0xff] }
0x1208   : > { %3423 = vrot.lane.b32.xlu0 %v4933_v58, %s4545_s20  ;;  %v3465_v58 = vld [vmem:[%s4654_s24 + $0x8] sm:$0xff] }
0x120c   : > { %3431 = vrot.lane.b32.xlu0 %v2979_v32, %s4546_s16 }
0x1267   : > { %v3229_v53 = vpop.xlane.xlu0 %3228 }
0x1268   : > { %4482 = vrcp.f32 %v3229_v53  ;;  %v3605_v53 = vld [vmem:[%s4667_s17 + $0x18] sm:$0xff] }
0x1269   : > { %4332 = vmatprep.subr.mxu1 %v3605_v53 }
0x126b   : > { %v3232_v54 = vpop.xlane.xlu0 %3231 }
0x126c   : > { %4484 = vrcp.f32 %v3232_v54  ;;  %v3604_v54 = vld [vmem:[%s4667_s17 + $0x10] sm:$0xff] }
0x126f   : > { %v3238_v55 = vpop.permute.xlu0 %3237 }
0x1270   : > { %4312 = vmatpush3.msra.mxu0 %v3238_v55  ;;  %v3603_v55 = vld [vmem:[%s4667_s17 + $0x8] sm:$0xff] }
0x1271   : > { %4321 = vmatprep.subr.mxu0 %v3467_v19 }
0x1273   : > { %v3400_v2 = vpop.permute.xlu0 %3399 }
0x1274   : > { %v3447_v15 = vsel %vm904_vm4, %v3445_v14, %v3400_v2  ;;  %v4043_v2 = vld [vmem:[%s584_s23] ss:$0 sm:$0xff]  ;;  %v3698_v14 = vld [vmem:[%s4681_s29 + $0x10] sm:$0xff] }
0x1275   : > { %v4483_v38 = vpop.eup %4482 }
0x1276   : > { %v3235_v56 = vmul.f32 %v4483_v38, %v4479_v12  ;;  %v3602_v38 = vld [vmem:[%s4667_s17] sm:$0xff] }
0x1277   : > { %v3408_v4 = vpop.permute.xlu0 %3407 }
0x1278   : > { %4314 = vmatmul.mubr.msk.f32.vlgmr.msra.gmra.mxu0 %vm904_vm4, %v3235_v56  ;;  %v3450_v17 = vsel %vm3449_vm5, %v3447_v15, %v3408_v4  ;;  %v3703_v56 = vld [vmem:[%s4681_s29 + $0x38] sm:$0xff]  ;;  %v3697_v15 = vld [vmem:[%s4681_s29 + $0x8] sm:$0xff] }
0x1279   : > { %v4485_v10 = vpop.eup %4484  ;;  %4322 = vmatpush3.msra.mxu0 %v3467_v19  ;;  %v3700_v19 = vld [vmem:[%s4681_s29 + $0x20] sm:$0xff] }
0x127a   : > { %v3236_v47 = vmul.f32 %v4485_v10, %v4481_v21  ;;  %4323 = vmatprep.subr.mxu0 %v3466_v57  ;;  %v3702_v10 = vld [vmem:[%s4681_s29 + $0x30] sm:$0xff] }
0x127b   : > { %4324 = vmatpush3.msra.mxu0 %v3466_v57  ;;  %v3416_v8 = vpop.permute.xlu0 %3415 }
0x127c   : > { %4319 = vmatmul.mubr.msk.f32.vlgmr.msra.gmra.mxu1 %vm904_vm4, %v3236_v47  ;;  %4325 = vmatprep.subr.mxu0 %v3465_v58  ;;  %v3453_v18 = vsel %vm3452_vm6, %v3450_v17, %v3416_v8  ;;  %v3701_v47 = vld [vmem:[%s4681_s29 + $0x28] sm:$0xff]  ;;  %v4044_v17 = vld [vmem:[%s592_s3] ss:$0 sm:$0xff] }
0x127d   : > { %4326 = vmatpush3.msra.mxu0 %v3465_v58  ;;  %4333 = vmatpush3.msra.mxu1 %v3605_v53 }
0x127e   : > { %4327 = vmatprep.subr.mxu0 %v3464_v59  ;;  %4334 = vmatprep.subr.mxu1 %v3604_v54 }
0x127f   : > { %4328 = vmatpush3.msra.mxu0 %v3464_v59  ;;  %v3424_v11 = vpop.permute.xlu0 %3423  ;;  %4335 = vmatpush3.msra.mxu1 %v3604_v54 }
0x1280   : > { %v3456_v22 = vsel %vm3455_vm7, %v3453_v18, %v3424_v11  ;;  %4336 = vmatprep.subr.mxu1 %v3603_v55  ;;  %4343 = vmatprep.subr.mxu0 %v3703_v56 }
0x1281   : > { %4337 = vmatpush3.msra.mxu1 %v3603_v55 }
0x1282   : > { %4338 = vmatprep.subr.mxu1 %v3602_v38 }
0x1283   : > { %v3432_v16 = vpop.permute.xlu0 %3431  ;;  %4339 = vmatpush3.msra.mxu1 %v3602_v38 }
0x1284   : > { %v3459_v25 = vsel %vm3458_vm9, %v3456_v22, %v3432_v16  ;;  %v3696_v16 = vld [vmem:[%s4681_s29] sm:$0xff] }
0x1338   : > { %v3309_v60 = vpop.f32.mrf.mxu0 }
0x1339   : > { %3439 = vrot.lane.b32.xlu0 %v3309_v60, %s4547_s18 }
0x133a   : > { %v4315_v61 = vpop.f32.mrf.mxu0 }
0x133c   : > { %v3385_v62 = vpop.f32.mrf.mxu1 }
0x133d   : > { %3441 = vrot.lane.b32.xlu1 %v3385_v62, %s4547_s18 }
0x133e   : > { %v4320_v63 = vpop.f32.mrf.mxu1 }
0x13ab   : > { %v3440_v5 = vpop.permute.xlu0 %3439 }
0x13ac   : > { %v3462_v27 = vsel %vm3461_vm8, %v3459_v25, %v3440_v5  ;;  %v4047_v5 = vld [vmem:[%s600_s5] ss:$0 sm:$0xff] }
0x13ad   : > { %4329 = vmatprep.mubr.msk.f32.mxu0 %vm620_vm1, %v3462_v27 }
0x13af   : > { %v3442_v31 = vpop.permute.xlu1 %3441 }
0x13b0   : > { %v3463_v32 = vsel %vm3461_vm8, %v3460_v30, %v3442_v31 }
0x13b1   : > { %4330 = vmatmul.mubr.msk.f32.vlgmr.msra.gmra.mxu0 %vm620_vm1, %v3463_v32 }
0x13b2   : > { %4344 = vmatpush3.msra.mxu0 %v3703_v56 }
0x13b3   : > { %4345 = vmatprep.subr.mxu0 %v3702_v10 }
0x13b4   : > { %4346 = vmatpush3.msra.mxu0 %v3702_v10 }
0x13b5   : > { %4347 = vmatprep.subr.mxu0 %v3701_v47 }
0x13b6   : > { %4348 = vmatpush3.msra.mxu0 %v3701_v47 }
0x13b7   : > { %4349 = vmatprep.subr.mxu0 %v3700_v19 }
0x13b8   : > { %4350 = vmatpush3.msra.mxu0 %v3700_v19 }
0x13b9   : > { %4351 = vmatprep.subr.mxu0 %v3699_v13 }
0x13ba   : > { %4352 = vmatpush3.msra.mxu0 %v3699_v13 }
0x13bb   : > { %4353 = vmatprep.subr.mxu0 %v3698_v14 }
0x13bc   : > { %4354 = vmatpush3.msra.mxu0 %v3698_v14 }
0x13bd   : > { %4355 = vmatprep.subr.mxu0 %v3697_v15 }
0x13be   : > { %4356 = vmatpush3.msra.mxu0 %v3697_v15 }
0x13bf   : > { %4357 = vmatprep.subr.mxu0 %v3696_v16 }
0x13c0   : > { %4358 = vmatpush3.msra.mxu0 %v3696_v16 }
0x1471   : > { %v4331_v33 = vpop.f32.mrf.mxu0 }
0x1472   : > { %v3553_v34 = vadd.f32 %v4331_v33, %v4039_v7 }
0x1473   : > { %v3547_v35 = vpop.f32.mrf.mxu0 }
0x1474   : > { %v5005_v41 = vadd.f32 %v4490_v39, %v3553_v34  ;;  %v3548_v43 = vadd.f32 %v4039_v7, %v3547_v35 }
0x1476   : > { %v5010_v45 = vadd.f32 %v4491_v44, %v3548_v43  ;;  %v3563_v46 = vsel %vm620_vm1, %v5005_v41, 0.0 }
0x1477   : > { %3564 = vadd.xlane.f32.xlu1 %v3563_v46 }
0x1478   : > { %v3560_v36 = vsel %vm620_vm1, %v5010_v45, 0.0 }
0x1479   : > { %3561 = vadd.xlane.f32.xlu0 %v3560_v36 }
0x1500   : > { %v3565_v37 = vpop.xlane.xlu1 %3564 }
0x1501   : > { %v3567_v48 = vmul.f32 0.03125, %v3565_v37 }
0x1502   : > { %v3562_v40 = vpop.xlane.xlu0 %3561 }
0x1503   : > { %v3566_v42 = vmul.f32 0.03125, %v3562_v40  ;;  %v3569_v50 = vsub.f32 %v5005_v41, %v3567_v48 }
0x1505   : > { %v3568_v51 = vsub.f32 %v5010_v45, %v3566_v42  ;;  %v3571_v21 = vmul.f32 %v3569_v50, %v3569_v50 }
0x1507   : > { %v3570_v12 = vmul.f32 %v3568_v51, %v3568_v51  ;;  %v3575_v52 = vsel %vm620_vm1, %v3571_v21, 0.0 }
0x1509   : > { %v3572_v49 = vsel %vm620_vm1, %v3570_v12, 0.0 }
0x150a   : > { %3573 = vadd.xlane.f32.xlu0 %v3572_v49 }
0x150e   : > { %3576 = vadd.xlane.f32.xlu0 %v3575_v52 }
0x1593   : > { %v3574_v57 = vpop.xlane.xlu0 %3573 }
0x1594   : > { %v3578_v58 = vmul.f32 0.03125, %v3574_v57 }
0x1596   : > { %v3580_v59 = vadd.f32 1e-05, %v3578_v58 }
0x1597   : > { %v3577_v60 = vpop.xlane.xlu0 %3576 }
0x1598   : > { %4486 = vrsqrt.f32 %v3580_v59  ;;  %v3579_v61 = vmul.f32 0.03125, %v3577_v60 }
0x159a   : > { %v3581_v62 = vadd.f32 1e-05, %v3579_v61 }
0x159c   : > { %4488 = vrsqrt.f32 %v3581_v62 }
0x15a5   : > { %v4487_v63 = vpop.eup %4486 }
0x15a6   : > { %v3584_v1 = vmul.f32 %v4487_v63, %v3568_v51 }
0x15a8   : > { %v3592_v3 = vmul.f32 %v4042_v0, %v3584_v1 }
0x15a9   : > { %v4489_v4 = vpop.eup %4488 }
0x15aa   : > { %v3585_v6 = vmul.f32 %v4489_v4, %v3569_v50  ;;  %v3600_v8 = vadd.f32 %v4043_v2, %v3592_v3 }
0x15ac   : > { %v3593_v9 = vmul.f32 %v4042_v0, %v3585_v6  ;;  %4340 = vmatprep.mubr.msk.f32.mxu1 %vm620_vm1, %v3600_v8 }
0x15ae   : > { %v3601_v11 = vadd.f32 %v4043_v2, %v3593_v9 }
0x15b0   : > { %4341 = vmatmul.mubr.msk.f32.vlgmr.msra.gmra.mxu1 %vm620_vm1, %v3601_v11 }
0x1670   : > { %v4342_v18 = vpop.f32.mrf.mxu1 }
0x1671   : > { %v3691_v20 = vadd.f32 %v4342_v18, %v4044_v17 }
0x1672   : > { %v3685_v22 = vpop.f32.mrf.mxu1 }
0x1673   : > { %v3686_v23 = vadd.f32 %v4044_v17, %v3685_v22  ;;  %v3695_v25 = vmax.f32 %v3691_v20, 0.0 }
0x1675   : > { %v3694_v24 = vmax.f32 %v3686_v23, 0.0 }
0x1677   : > { %4359 = vmatprep.mubr.msk.f32.mxu0 %vm3711_vm10, %v3694_v24 }
0x1678   : > { %4360 = vmatmul.mubr.msk.f32.vlgmr.msra.gmra.mxu0 %vm3711_vm10, %v3695_v25 }
0x1738   : > { %v4361_v26 = vpop.f32.mrf.mxu0 }
0x1739   : > { %v3790_v27 = vadd.f32 %v4361_v26, %v4047_v5 }
0x173a   : > { %v3784_v28 = vpop.f32.mrf.mxu0 }
0x173b   : > { %v3794_v29 = vadd.f32 %v3790_v27, %v5005_v41  ;;  %v3785_v30 = vadd.f32 %v4047_v5, %v3784_v28 }
0x173d   : > { %3796 = vst.msk [vmem:[%s5085_s12 + $0x8] sm:$0xff] %vm620_vm1, %v3794_v29  ;;  %v3793_v31 = vadd.f32 %v3785_v30, %v5010_v45 }
0x173f   : > { %3795 = vst.msk [vmem:[%s5085_s12] sm:$0xff] %vm620_vm1, %v3793_v31 }
0x1740 PF: > { %s5102_s5 = sld [smem:[#allocation3_spill]] }
0x1741   : > { %s5103_s21 = sld [smem:[#allocation2_spill]] }
0x1742   : > { %s5104_s22 = sld [smem:[#allocation4_spill]] }
0x1746   : > { %s22_s23 = sadd.s32 1, %s5102_s5  }
0x1747   : > { %p19_p6 = scmp.ge.s32.totalorder %s22_s23, 4  }
0x1749   :  { %21 = sbr.rel (!%p19_p6) target bundleno = 4 (0x4), region = 135 }

</bundles_post_ra>
